<compile_context>
chip_gen: v7x
topology: tpu7x:2x2x1
jax: 0.10.0
libtpu: 0.0.40
codegen_flags: <defaults>
</compile_context>

<pallas_src>
import functools
import math

import jax
import jax.numpy as jnp
from jax.experimental import pallas as pl
from jax.experimental.pallas import tpu as pltpu


def decoder_layer_kernel(xq_ref, xkv_ref,
                         wq_ref, bq_ref, wkv_ref, bkv_ref,
                         wo_ref, bo_ref,
                         ln1_g_ref, ln1_b_ref,
                         w1_ref, b1_ref, w2_ref, b2_ref,
                         ln2_g_ref, ln2_b_ref,
                         out_ref, *, n_heads):
    f32 = jnp.float32
    bf16 = jnp.bfloat16

    xq = xq_ref[0]        # (TQ, D) f32 — query rows handled by this grid step
    xkv = xkv_ref[0]      # (S,  D) f32 — full sequence for K/V
    TQ, D = xq.shape
    S = xkv.shape[0]
    H = n_heads
    hd = D // H

    xq_b = xq.astype(bf16)
    xkv_b = xkv.astype(bf16)

    # --- projections: lane-dense fused matmuls (Q -> D cols, KV -> 2D cols) ---
    # 1/sqrt(hd) is pre-folded into wq / bq in the wrapper.
    q = jnp.dot(xq_b, wq_ref[...], preferred_element_type=f32) + bq_ref[...]       # (TQ, D)
    kv = jnp.dot(xkv_b, wkv_ref[...], preferred_element_type=f32) + bkv_ref[...]   # (S, 2D)

    q3 = q.reshape(TQ, H, hd)                                                      # (TQ, H, hd)
    k3 = kv[:, :D].reshape(S, H, hd)                                               # (S, H, hd)
    v3 = kv[:, D:].reshape(S, H, hd)                                               # (S, H, hd)

    # --- attention scores + softmax (f32) ---
    s = jnp.einsum('qhe,khe->hqk', q3.astype(bf16), k3.astype(bf16),
                   preferred_element_type=f32)                                     # (H, TQ, S)
    s = s - jnp.max(s, axis=-1, keepdims=True)
    p = jnp.exp(s)
    # Approx EUP reciprocal: fine at the 2e-2 test tolerance; set approx=False for tighter accuracy.
    p = p * pl.reciprocal(jnp.sum(p, axis=-1, keepdims=True), approx=True)

    o = jnp.einsum('hqk,khe->qhe', p.astype(bf16), v3.astype(bf16),
                   preferred_element_type=f32)                                     # (TQ, H, hd)

    # --- output projection: concat heads -> single lane-dense matmul, head sum in MXU ---
    attn = jnp.dot(o.reshape(TQ, D).astype(bf16), wo_ref[...],
                   preferred_element_type=f32) + bo_ref[...]                       # (TQ, D)

    # --- residual + LayerNorm (attention), f32 ---
    y = xq + attn
    mu = jnp.mean(y, axis=-1, keepdims=True)
    var = jnp.mean((y - mu) ** 2, axis=-1, keepdims=True)
    y = (y - mu) * jax.lax.rsqrt(var + 1e-5) * ln1_g_ref[...] + ln1_b_ref[...]

    # --- feed forward (dropout = identity in eval) ---
    h1 = jnp.dot(y.astype(bf16), w1_ref[...], preferred_element_type=f32) + b1_ref[...]
    h1 = jnp.maximum(h1, 0.0)
    ff = jnp.dot(h1.astype(bf16), w2_ref[...], preferred_element_type=f32) + b2_ref[...]

    # --- residual + LayerNorm (ff) ---
    z = y + ff
    mu2 = jnp.mean(z, axis=-1, keepdims=True)
    var2 = jnp.mean((z - mu2) ** 2, axis=-1, keepdims=True)
    out_ref[0] = (z - mu2) * jax.lax.rsqrt(var2 + 1e-5) * ln2_g_ref[...] + ln2_b_ref[...]


def _vmem_limit_bytes():
    cap = 64 * 1024 * 1024
    try:
        info = pltpu.get_tpu_info()
        cap = int(getattr(info, "vmem_capacity_bytes", cap))
    except Exception:
        pass
    # Leave headroom for compiler scratch; ~48 MiB on v7x (64 MiB), ~96 MiB on v5e/v6e (128 MiB).
    return max(32 * 1024 * 1024, min(cap * 3 // 4, 100 * 1024 * 1024))


def decoder_layer(x, params, n_heads, q_tile=256):
    B, S, D = x.shape
    F = params["w1_t"].shape[1]
    hd = D // n_heads
    bf16 = jnp.bfloat16
    scale = 1.0 / math.sqrt(hd)

    TQ = min(S, q_tile)
    NQ = pl.cdiv(S, TQ)

    # Wrapper-side (XLA) weight prep: fused/split projections, scale folded into Q, bf16 MXU operands.
    w_in = params["w_in_t"]                        # (D, 3D)
    b_in = params["b_in"][0]                       # (3D,)
    wq = (w_in[:, :D] * scale).astype(bf16)        # (D, D)   scale folded
    wkv = w_in[:, D:].astype(bf16)                 # (D, 2D)
    bq = (b_in[:D] * scale).reshape(1, D)          # f32
    bkv = b_in[D:].reshape(1, 2 * D)               # f32
    wo = params["wo_t"].astype(bf16)               # (D, D)
    w1 = params["w1_t"].astype(bf16)               # (D, F)
    w2 = params["w2_t"].astype(bf16)               # (F, D)

    def resident(shape):
        # Constant-index weight/bias block: keep resident, single buffer (no double-buffering).
        return pl.BlockSpec(shape, lambda b, i: (0,) * len(shape),
                            pipeline_mode=pl.Buffered(1))

    kernel = functools.partial(decoder_layer_kernel, n_heads=n_heads)
    return pl.pallas_call(
        kernel,
        out_shape=jax.ShapeDtypeStruct((B, S, D), jnp.float32),
        grid_spec=pltpu.PrefetchScalarGridSpec(
            num_scalar_prefetch=0,
            grid=(B, NQ),
            in_specs=[
                pl.BlockSpec((1, TQ, D), lambda b, i: (b, i, 0)),   # x, query tile
                pl.BlockSpec((1, S, D), lambda b, i: (b, 0, 0)),    # x, full sequence (K/V)
                resident((D, D)), resident((1, D)),                 # Wq, bq (scale folded)
                resident((D, 2 * D)), resident((1, 2 * D)),         # Wkv, bkv
                resident((D, D)), resident((1, D)),                 # Wo, bo
                resident((1, D)), resident((1, D)),                 # ln1 gamma, beta
                resident((D, F)), resident((1, F)),                 # ff linear1
                resident((F, D)), resident((1, D)),                 # ff linear2
                resident((1, D)), resident((1, D)),                 # ln2 gamma, beta
            ],
            out_specs=pl.BlockSpec((1, TQ, D), lambda b, i: (b, i, 0)),
        ),
        compiler_params=pltpu.CompilerParams(
            dimension_semantics=("parallel", "parallel"),
            vmem_limit_bytes=_vmem_limit_bytes(),
        ),
    )(x, x, wq, bq, wkv, bkv, wo, params["bo"],
      params["ln1_g"], params["ln1_b"],
      w1, params["b1"], w2, params["b2"],
      params["ln2_g"], params["ln2_b"])


def reference_decoder_layer(x, params, n_heads):
    """Pure-JAX f32 reference mirroring the PyTorch forward (dropout = identity)."""
    B, S, D = x.shape
    hd = D // n_heads
    qkv = x @ params["w_in_t"] + params["b_in"][0]
    q, k, v = qkv[..., :D], qkv[..., D:2 * D], qkv[..., 2 * D:]

    def split(t):
        return t.reshape(B, S, n_heads, hd).transpose(0, 2, 1, 3)  # (B, H, S, hd)

    q, k, v = split(q), split(k), split(v)
    s = jnp.einsum("bhqd,bhkd->bhqk", q, k) / math.sqrt(hd)
    p = jax.nn.softmax(s, axis=-1)
    o = jnp.einsum("bhqk,bhkd->bhqd", p, v).transpose(0, 2, 1, 3).reshape(B, S, D)
    attn = o @ params["wo_t"] + params["bo"][0]

    def ln(t, g, b):
        mu = t.mean(-1, keepdims=True)
        var = ((t - mu) ** 2).mean(-1, keepdims=True)
        return (t - mu) / jnp.sqrt(var + 1e-5) * g[0] + b[0]

    y = ln(x + attn, params["ln1_g"], params["ln1_b"])
    ff = jnp.maximum(y @ params["w1_t"] + params["b1"][0], 0.0) @ params["w2_t"] + params["b2"][0]
    return ln(y + ff, params["ln2_g"], params["ln2_b"])


def init_params(key, d_model, d_ff):
    ks = jax.random.split(key, 8)
    s = 0.05
    return {
        "w_in_t": s * jax.random.normal(ks[0], (d_model, 3 * d_model), jnp.float32),
        "b_in":   s * jax.random.normal(ks[1], (1, 3 * d_model), jnp.float32),
        "wo_t":   s * jax.random.normal(ks[2], (d_model, d_model), jnp.float32),
        "bo":     s * jax.random.normal(ks[3], (1, d_model), jnp.float32),
        "ln1_g":  jnp.ones((1, d_model), jnp.float32),
        "ln1_b":  jnp.zeros((1, d_model), jnp.float32),
        "w1_t":   s * jax.random.normal(ks[4], (d_model, d_ff), jnp.float32),
        "b1":     s * jax.random.normal(ks[5], (1, d_ff), jnp.float32),
        "w2_t":   s * jax.random.normal(ks[6], (d_ff, d_model), jnp.float32),
        "b2":     s * jax.random.normal(ks[7], (1, d_model), jnp.float32),
        "ln2_g":  jnp.ones((1, d_model), jnp.float32),
        "ln2_b":  jnp.zeros((1, d_model), jnp.float32),
    }


if __name__ == "__main__":
    B, S, d_model, n_heads, d_ff = 2, 8, 32, 4, 64
    key = jax.random.PRNGKey(0)
    kx, kp = jax.random.split(key)
    x = jax.random.normal(kx, (B, S, d_model), jnp.float32)
    params = init_params(kp, d_model, d_ff)

    out = jax.block_until_ready(decoder_layer(x, params, n_heads))
    ref = reference_decoder_layer(x, params, n_heads)
    assert out.shape == (B, S, d_model)
    # bf16 MXU operands + approx reciprocal -> looser tolerance vs. the f32 reference.
    assert jnp.allclose(out, ref, atol=2e-2, rtol=2e-2), "mismatch vs reference"
    print("KERNEL_OK")
</pallas_src>

<mosaic_0001>
module attributes {stable_mosaic.version = 11 : i64} {
  func.func @decoder_layer_kernel(%arg0: i32, %arg1: i32, %arg2: memref<1x8x32xf32, #tpu.memory_space<vmem>>, %arg3: memref<1x8x32xf32, #tpu.memory_space<vmem>>, %arg4: memref<32x32xbf16, #tpu.memory_space<vmem>>, %arg5: memref<1x32xf32, #tpu.memory_space<vmem>>, %arg6: memref<32x64xbf16, #tpu.memory_space<vmem>>, %arg7: memref<1x64xf32, #tpu.memory_space<vmem>>, %arg8: memref<32x32xbf16, #tpu.memory_space<vmem>>, %arg9: memref<1x32xf32, #tpu.memory_space<vmem>>, %arg10: memref<1x32xf32, #tpu.memory_space<vmem>>, %arg11: memref<1x32xf32, #tpu.memory_space<vmem>>, %arg12: memref<32x64xbf16, #tpu.memory_space<vmem>>, %arg13: memref<1x64xf32, #tpu.memory_space<vmem>>, %arg14: memref<64x32xbf16, #tpu.memory_space<vmem>>, %arg15: memref<1x32xf32, #tpu.memory_space<vmem>>, %arg16: memref<1x32xf32, #tpu.memory_space<vmem>>, %arg17: memref<1x32xf32, #tpu.memory_space<vmem>>, %arg18: memref<1x8x32xf32, #tpu.memory_space<vmem>>) attributes {dimension_semantics = [#tpu.dimension_semantics<parallel>, #tpu.dimension_semantics<parallel>], iteration_bounds = array<i64: 2, 1>, scalar_prefetch = 0 : i64, scratch_operands = 0 : i64, tpu.core_type = #tpu.core_type<tc>, window_params = [{transform_indices = @transform_0, window_bounds = array<i64: 1, 8, 32>}, {transform_indices = @transform_1, window_bounds = array<i64: 1, 8, 32>}, {pipeline_mode = #tpu.pipeline_mode<synchronous>, transform_indices = @transform_2, window_bounds = array<i64: 32, 32>}, {pipeline_mode = #tpu.pipeline_mode<synchronous>, transform_indices = @transform_3, window_bounds = array<i64: 1, 32>}, {pipeline_mode = #tpu.pipeline_mode<synchronous>, transform_indices = @transform_4, window_bounds = array<i64: 32, 64>}, {pipeline_mode = #tpu.pipeline_mode<synchronous>, transform_indices = @transform_5, window_bounds = array<i64: 1, 64>}, {pipeline_mode = #tpu.pipeline_mode<synchronous>, transform_indices = @transform_6, window_bounds = array<i64: 32, 32>}, {pipeline_mode = #tpu.pipeline_mode<synchronous>, transform_indices = @transform_7, window_bounds = array<i64: 1, 32>}, {pipeline_mode = #tpu.pipeline_mode<synchronous>, transform_indices = @transform_8, window_bounds = array<i64: 1, 32>}, {pipeline_mode = #tpu.pipeline_mode<synchronous>, transform_indices = @transform_9, window_bounds = array<i64: 1, 32>}, {pipeline_mode = #tpu.pipeline_mode<synchronous>, transform_indices = @transform_10, window_bounds = array<i64: 32, 64>}, {pipeline_mode = #tpu.pipeline_mode<synchronous>, transform_indices = @transform_11, window_bounds = array<i64: 1, 64>}, {pipeline_mode = #tpu.pipeline_mode<synchronous>, transform_indices = @transform_12, window_bounds = array<i64: 64, 32>}, {pipeline_mode = #tpu.pipeline_mode<synchronous>, transform_indices = @transform_13, window_bounds = array<i64: 1, 32>}, {pipeline_mode = #tpu.pipeline_mode<synchronous>, transform_indices = @transform_14, window_bounds = array<i64: 1, 32>}, {pipeline_mode = #tpu.pipeline_mode<synchronous>, transform_indices = @transform_15, window_bounds = array<i64: 1, 32>}, {transform_indices = @transform_16, window_bounds = array<i64: 1, 8, 32>}]} {
    %c0 = arith.constant 0 : index
    %c0_0 = arith.constant 0 : index
    %c0_1 = arith.constant 0 : index
    %0 = vector.load %arg2[%c0, %c0_0, %c0_1] : memref<1x8x32xf32, #tpu.memory_space<vmem>>, vector<1x8x32xf32>
    %1 = vector.shape_cast %0 : vector<1x8x32xf32> to vector<8x32xf32>
    %c0_2 = arith.constant 0 : index
    %c0_3 = arith.constant 0 : index
    %c0_4 = arith.constant 0 : index
    %2 = vector.load %arg3[%c0_2, %c0_3, %c0_4] : memref<1x8x32xf32, #tpu.memory_space<vmem>>, vector<1x8x32xf32>
    %3 = vector.shape_cast %2 : vector<1x8x32xf32> to vector<8x32xf32>
    %4 = arith.truncf %1 : vector<8x32xf32> to vector<8x32xbf16>
    %5 = arith.truncf %3 : vector<8x32xf32> to vector<8x32xbf16>
    %c0_5 = arith.constant 0 : index
    %c0_6 = arith.constant 0 : index
    %6 = vector.load %arg4[%c0_5, %c0_6] : memref<32x32xbf16, #tpu.memory_space<vmem>>, vector<32x32xbf16>
    %cst = arith.constant dense<0.000000e+00> : vector<8x32xf32>
    %7 = tpu.matmul %4, %6, %cst {dimension_numbers = #tpu.dot_dimension_numbers<[1], [0], [0], [1], [0, 0, 1, 1], [], []>} : vector<8x32xbf16>, vector<32x32xbf16>, vector<8x32xf32> -> vector<8x32xf32>
    %c0_7 = arith.constant 0 : index
    %c0_8 = arith.constant 0 : index
    %8 = vector.load %arg5[%c0_7, %c0_8] : memref<1x32xf32, #tpu.memory_space<vmem>>, vector<1x32xf32>
    %9 = vector.broadcast %8 : vector<1x32xf32> to vector<8x32xf32>
    %10 = arith.addf %7, %9 : vector<8x32xf32>
    %c0_9 = arith.constant 0 : index
    %c0_10 = arith.constant 0 : index
    %11 = vector.load %arg6[%c0_9, %c0_10] : memref<32x64xbf16, #tpu.memory_space<vmem>>, vector<32x64xbf16>
    %cst_11 = arith.constant dense<0.000000e+00> : vector<8x64xf32>
    %12 = tpu.matmul %5, %11, %cst_11 {dimension_numbers = #tpu.dot_dimension_numbers<[1], [0], [0], [1], [0, 0, 1, 1], [], []>} : vector<8x32xbf16>, vector<32x64xbf16>, vector<8x64xf32> -> vector<8x64xf32>
    %c0_12 = arith.constant 0 : index
    %c0_13 = arith.constant 0 : index
    %13 = vector.load %arg7[%c0_12, %c0_13] : memref<1x64xf32, #tpu.memory_space<vmem>>, vector<1x64xf32>
    %14 = vector.broadcast %13 : vector<1x64xf32> to vector<8x64xf32>
    %15 = arith.addf %12, %14 : vector<8x64xf32>
    %16 = vector.shape_cast %10 : vector<8x32xf32> to vector<8x4x8xf32>
    %17 = vector.extract_strided_slice %15 {offsets = [0, 0], sizes = [8, 32], strides = [1, 1]} : vector<8x64xf32> to vector<8x32xf32>
    %18 = vector.shape_cast %17 : vector<8x32xf32> to vector<8x4x8xf32>
    %19 = vector.extract_strided_slice %15 {offsets = [0, 32], sizes = [8, 32], strides = [1, 1]} : vector<8x64xf32> to vector<8x32xf32>
    %20 = vector.shape_cast %19 : vector<8x32xf32> to vector<8x4x8xf32>
    %21 = arith.truncf %16 : vector<8x4x8xf32> to vector<8x4x8xbf16>
    %22 = arith.truncf %18 : vector<8x4x8xf32> to vector<8x4x8xbf16>
    "tpu.trace_start"() <{level = 10 : i32, message = "qhe,khe->hqk"}> : () -> ()
    %cst_14 = arith.constant dense<0.000000e+00> : vector<4x8x8xf32>
    %23 = tpu.matmul %21, %22, %cst_14 {dimension_numbers = #tpu.dot_dimension_numbers<[2], [2], [0], [0], [0, 1, 0, 0, 1, 0], [1], [1]>} : vector<8x4x8xbf16>, vector<8x4x8xbf16>, vector<4x8x8xf32> -> vector<4x8x8xf32>
    "tpu.trace_stop"() : () -> ()
    %cst_15 = arith.constant dense<0xFF800000> : vector<4x8xf32>
    %24 = vector.multi_reduction <maximumf>, %23, %cst_15 [2] : vector<4x8x8xf32> to vector<4x8xf32>
    %25 = vector.shape_cast %24 : vector<4x8xf32> to vector<4x8x1xf32>
    %26 = vector.broadcast %25 : vector<4x8x1xf32> to vector<4x8x8xf32>
    %27 = arith.subf %23, %26 : vector<4x8x8xf32>
    %28 = math.exp %27 : vector<4x8x8xf32>
    %cst_16 = arith.constant dense<0.000000e+00> : vector<4x8xf32>
    %29 = vector.multi_reduction <add>, %28, %cst_16 [2] : vector<4x8x8xf32> to vector<4x8xf32>
    %30 = vector.shape_cast %29 : vector<4x8xf32> to vector<4x8x1xf32>
    %31 = tpu.reciprocal %30 {approx = true} : vector<4x8x1xf32> -> vector<4x8x1xf32>
    %32 = vector.broadcast %31 : vector<4x8x1xf32> to vector<4x8x8xf32>
    %33 = arith.mulf %28, %32 : vector<4x8x8xf32>
    %34 = arith.truncf %33 : vector<4x8x8xf32> to vector<4x8x8xbf16>
    %35 = arith.truncf %20 : vector<8x4x8xf32> to vector<8x4x8xbf16>
    "tpu.trace_start"() <{level = 10 : i32, message = "hqk,khe->qhe"}> : () -> ()
    %cst_17 = arith.constant dense<0.000000e+00> : vector<4x8x8xf32>
    %36 = tpu.matmul %35, %34, %cst_17 {dimension_numbers = #tpu.dot_dimension_numbers<[0], [2], [2], [1], [0, 1, 0, 2, 1, 1], [1], [0]>} : vector<8x4x8xbf16>, vector<4x8x8xbf16>, vector<4x8x8xf32> -> vector<4x8x8xf32>
    %37 = tpu.transpose %36, [2, 0, 1] : vector<4x8x8xf32> -> vector<8x4x8xf32>
    "tpu.trace_stop"() : () -> ()
    %38 = vector.shape_cast %37 : vector<8x4x8xf32> to vector<8x32xf32>
    %39 = arith.truncf %38 : vector<8x32xf32> to vector<8x32xbf16>
    %c0_18 = arith.constant 0 : index
    %c0_19 = arith.constant 0 : index
    %40 = vector.load %arg8[%c0_18, %c0_19] : memref<32x32xbf16, #tpu.memory_space<vmem>>, vector<32x32xbf16>
    %cst_20 = arith.constant dense<0.000000e+00> : vector<8x32xf32>
    %41 = tpu.matmul %39, %40, %cst_20 {dimension_numbers = #tpu.dot_dimension_numbers<[1], [0], [0], [1], [0, 0, 1, 1], [], []>} : vector<8x32xbf16>, vector<32x32xbf16>, vector<8x32xf32> -> vector<8x32xf32>
    %c0_21 = arith.constant 0 : index
    %c0_22 = arith.constant 0 : index
    %42 = vector.load %arg9[%c0_21, %c0_22] : memref<1x32xf32, #tpu.memory_space<vmem>>, vector<1x32xf32>
    %43 = vector.broadcast %42 : vector<1x32xf32> to vector<8x32xf32>
    %44 = arith.addf %41, %43 : vector<8x32xf32>
    %45 = arith.addf %1, %44 : vector<8x32xf32>
    %cst_23 = arith.constant dense<0.000000e+00> : vector<8xf32>
    %46 = vector.multi_reduction <add>, %45, %cst_23 [1] : vector<8x32xf32> to vector<8xf32>
    %47 = vector.shape_cast %46 : vector<8xf32> to vector<8x1xf32>
    %cst_24 = arith.constant 3.200000e+01 : f32
    %48 = vector.broadcast %cst_24 : f32 to vector<8x1xf32>
    %49 = arith.divf %47, %48 : vector<8x1xf32>
    %50 = vector.broadcast %49 : vector<8x1xf32> to vector<8x32xf32>
    %51 = arith.subf %45, %50 : vector<8x32xf32>
    %52 = arith.mulf %51, %51 : vector<8x32xf32>
    %cst_25 = arith.constant dense<0.000000e+00> : vector<8xf32>
    %53 = vector.multi_reduction <add>, %52, %cst_25 [1] : vector<8x32xf32> to vector<8xf32>
    %54 = vector.shape_cast %53 : vector<8xf32> to vector<8x1xf32>
    %cst_26 = arith.constant 3.200000e+01 : f32
    %55 = vector.broadcast %cst_26 : f32 to vector<8x1xf32>
    %56 = arith.divf %54, %55 : vector<8x1xf32>
    %57 = vector.broadcast %49 : vector<8x1xf32> to vector<8x32xf32>
    %58 = arith.subf %45, %57 : vector<8x32xf32>
    %cst_27 = arith.constant 9.99999974E-6 : f32
    %59 = vector.broadcast %cst_27 : f32 to vector<8x1xf32>
    %60 = arith.addf %56, %59 : vector<8x1xf32>
    %61 = math.rsqrt %60 : vector<8x1xf32>
    %62 = vector.broadcast %61 : vector<8x1xf32> to vector<8x32xf32>
    %63 = arith.mulf %58, %62 : vector<8x32xf32>
    %c0_28 = arith.constant 0 : index
    %c0_29 = arith.constant 0 : index
    %64 = vector.load %arg10[%c0_28, %c0_29] : memref<1x32xf32, #tpu.memory_space<vmem>>, vector<1x32xf32>
    %65 = vector.broadcast %64 : vector<1x32xf32> to vector<8x32xf32>
    %66 = arith.mulf %63, %65 : vector<8x32xf32>
    %c0_30 = arith.constant 0 : index
    %c0_31 = arith.constant 0 : index
    %67 = vector.load %arg11[%c0_30, %c0_31] : memref<1x32xf32, #tpu.memory_space<vmem>>, vector<1x32xf32>
    %68 = vector.broadcast %67 : vector<1x32xf32> to vector<8x32xf32>
    %69 = arith.addf %66, %68 : vector<8x32xf32>
    %70 = arith.truncf %69 : vector<8x32xf32> to vector<8x32xbf16>
    %c0_32 = arith.constant 0 : index
    %c0_33 = arith.constant 0 : index
    %71 = vector.load %arg12[%c0_32, %c0_33] : memref<32x64xbf16, #tpu.memory_space<vmem>>, vector<32x64xbf16>
    %cst_34 = arith.constant dense<0.000000e+00> : vector<8x64xf32>
    %72 = tpu.matmul %70, %71, %cst_34 {dimension_numbers = #tpu.dot_dimension_numbers<[1], [0], [0], [1], [0, 0, 1, 1], [], []>} : vector<8x32xbf16>, vector<32x64xbf16>, vector<8x64xf32> -> vector<8x64xf32>
    %c0_35 = arith.constant 0 : index
    %c0_36 = arith.constant 0 : index
    %73 = vector.load %arg13[%c0_35, %c0_36] : memref<1x64xf32, #tpu.memory_space<vmem>>, vector<1x64xf32>
    %74 = vector.broadcast %73 : vector<1x64xf32> to vector<8x64xf32>
    %75 = arith.addf %72, %74 : vector<8x64xf32>
    %cst_37 = arith.constant 0.000000e+00 : f32
    %76 = vector.broadcast %cst_37 : f32 to vector<8x64xf32>
    %77 = arith.maximumf %75, %76 : vector<8x64xf32>
    %78 = arith.truncf %77 : vector<8x64xf32> to vector<8x64xbf16>
    %c0_38 = arith.constant 0 : index
    %c0_39 = arith.constant 0 : index
    %79 = vector.load %arg14[%c0_38, %c0_39] : memref<64x32xbf16, #tpu.memory_space<vmem>>, vector<64x32xbf16>
    %cst_40 = arith.constant dense<0.000000e+00> : vector<8x32xf32>
    %80 = tpu.matmul %78, %79, %cst_40 {dimension_numbers = #tpu.dot_dimension_numbers<[1], [0], [0], [1], [0, 0, 1, 1], [], []>} : vector<8x64xbf16>, vector<64x32xbf16>, vector<8x32xf32> -> vector<8x32xf32>
    %c0_41 = arith.constant 0 : index
    %c0_42 = arith.constant 0 : index
    %81 = vector.load %arg15[%c0_41, %c0_42] : memref<1x32xf32, #tpu.memory_space<vmem>>, vector<1x32xf32>
    %82 = vector.broadcast %81 : vector<1x32xf32> to vector<8x32xf32>
    %83 = arith.addf %80, %82 : vector<8x32xf32>
    %84 = arith.addf %69, %83 : vector<8x32xf32>
    %cst_43 = arith.constant dense<0.000000e+00> : vector<8xf32>
    %85 = vector.multi_reduction <add>, %84, %cst_43 [1] : vector<8x32xf32> to vector<8xf32>
    %86 = vector.shape_cast %85 : vector<8xf32> to vector<8x1xf32>
    %cst_44 = arith.constant 3.200000e+01 : f32
    %87 = vector.broadcast %cst_44 : f32 to vector<8x1xf32>
    %88 = arith.divf %86, %87 : vector<8x1xf32>
    %89 = vector.broadcast %88 : vector<8x1xf32> to vector<8x32xf32>
    %90 = arith.subf %84, %89 : vector<8x32xf32>
    %91 = arith.mulf %90, %90 : vector<8x32xf32>
    %cst_45 = arith.constant dense<0.000000e+00> : vector<8xf32>
    %92 = vector.multi_reduction <add>, %91, %cst_45 [1] : vector<8x32xf32> to vector<8xf32>
    %93 = vector.shape_cast %92 : vector<8xf32> to vector<8x1xf32>
    %cst_46 = arith.constant 3.200000e+01 : f32
    %94 = vector.broadcast %cst_46 : f32 to vector<8x1xf32>
    %95 = arith.divf %93, %94 : vector<8x1xf32>
    %96 = vector.broadcast %88 : vector<8x1xf32> to vector<8x32xf32>
    %97 = arith.subf %84, %96 : vector<8x32xf32>
    %cst_47 = arith.constant 9.99999974E-6 : f32
    %98 = vector.broadcast %cst_47 : f32 to vector<8x1xf32>
    %99 = arith.addf %95, %98 : vector<8x1xf32>
    %100 = math.rsqrt %99 : vector<8x1xf32>
    %101 = vector.broadcast %100 : vector<8x1xf32> to vector<8x32xf32>
    %102 = arith.mulf %97, %101 : vector<8x32xf32>
    %c0_48 = arith.constant 0 : index
    %c0_49 = arith.constant 0 : index
    %103 = vector.load %arg16[%c0_48, %c0_49] : memref<1x32xf32, #tpu.memory_space<vmem>>, vector<1x32xf32>
    %104 = vector.broadcast %103 : vector<1x32xf32> to vector<8x32xf32>
    %105 = arith.mulf %102, %104 : vector<8x32xf32>
    %c0_50 = arith.constant 0 : index
    %c0_51 = arith.constant 0 : index
    %106 = vector.load %arg17[%c0_50, %c0_51] : memref<1x32xf32, #tpu.memory_space<vmem>>, vector<1x32xf32>
    %107 = vector.broadcast %106 : vector<1x32xf32> to vector<8x32xf32>
    %108 = arith.addf %105, %107 : vector<8x32xf32>
    %c0_52 = arith.constant 0 : index
    %c0_53 = arith.constant 0 : index
    %c0_54 = arith.constant 0 : index
    %109 = vector.load %arg18[%c0_52, %c0_53, %c0_54] : memref<1x8x32xf32, #tpu.memory_space<vmem>>, vector<1x8x32xf32>
    %110 = vector.shape_cast %109 : vector<1x8x32xf32> to vector<8x32xf32>
    %111 = vector.shape_cast %108 : vector<8x32xf32> to vector<1x8x32xf32>
    tpu.vector_store %arg18[%c0_52, %c0_53, %c0_54], %111 {strides = array<i32>} : memref<1x8x32xf32, #tpu.memory_space<vmem>>, vector<1x8x32xf32>,
    return
  }
  func.func @transform_0(%arg0: i32, %arg1: i32) -> (i32, i32, i32) {
    %c0_i32 = arith.constant 0 : i32
    %c0_i32_0 = arith.constant 0 : i32
    return %arg0, %arg1, %c0_i32 : i32, i32, i32
  }
  func.func @transform_1(%arg0: i32, %arg1: i32) -> (i32, i32, i32) {
    %c0_i32 = arith.constant 0 : i32
    %c0_i32_0 = arith.constant 0 : i32
    %c0_i32_1 = arith.constant 0 : i32
    return %arg0, %c0_i32, %c0_i32_0 : i32, i32, i32
  }
  func.func @transform_2(%arg0: i32, %arg1: i32) -> (i32, i32) {
    %c0_i32 = arith.constant 0 : i32
    %c0_i32_0 = arith.constant 0 : i32
    %c0_i32_1 = arith.constant 0 : i32
    return %c0_i32, %c0_i32_0 : i32, i32
  }
  func.func @transform_3(%arg0: i32, %arg1: i32) -> (i32, i32) {
    %c0_i32 = arith.constant 0 : i32
    %c0_i32_0 = arith.constant 0 : i32
    %c0_i32_1 = arith.constant 0 : i32
    return %c0_i32, %c0_i32_0 : i32, i32
  }
  func.func @transform_4(%arg0: i32, %arg1: i32) -> (i32, i32) {
    %c0_i32 = arith.constant 0 : i32
    %c0_i32_0 = arith.constant 0 : i32
    %c0_i32_1 = arith.constant 0 : i32
    return %c0_i32, %c0_i32_0 : i32, i32
  }
  func.func @transform_5(%arg0: i32, %arg1: i32) -> (i32, i32) {
    %c0_i32 = arith.constant 0 : i32
    %c0_i32_0 = arith.constant 0 : i32
    %c0_i32_1 = arith.constant 0 : i32
    return %c0_i32, %c0_i32_0 : i32, i32
  }
  func.func @transform_6(%arg0: i32, %arg1: i32) -> (i32, i32) {
    %c0_i32 = arith.constant 0 : i32
    %c0_i32_0 = arith.constant 0 : i32
    %c0_i32_1 = arith.constant 0 : i32
    return %c0_i32, %c0_i32_0 : i32, i32
  }
  func.func @transform_7(%arg0: i32, %arg1: i32) -> (i32, i32) {
    %c0_i32 = arith.constant 0 : i32
    %c0_i32_0 = arith.constant 0 : i32
    %c0_i32_1 = arith.constant 0 : i32
    return %c0_i32, %c0_i32_0 : i32, i32
  }
  func.func @transform_8(%arg0: i32, %arg1: i32) -> (i32, i32) {
    %c0_i32 = arith.constant 0 : i32
    %c0_i32_0 = arith.constant 0 : i32
    %c0_i32_1 = arith.constant 0 : i32
    return %c0_i32, %c0_i32_0 : i32, i32
  }
  func.func @transform_9(%arg0: i32, %arg1: i32) -> (i32, i32) {
    %c0_i32 = arith.constant 0 : i32
    %c0_i32_0 = arith.constant 0 : i32
    %c0_i32_1 = arith.constant 0 : i32
    return %c0_i32, %c0_i32_0 : i32, i32
  }
  func.func @transform_10(%arg0: i32, %arg1: i32) -> (i32, i32) {
    %c0_i32 = arith.constant 0 : i32
    %c0_i32_0 = arith.constant 0 : i32
    %c0_i32_1 = arith.constant 0 : i32
    return %c0_i32, %c0_i32_0 : i32, i32
  }
  func.func @transform_11(%arg0: i32, %arg1: i32) -> (i32, i32) {
    %c0_i32 = arith.constant 0 : i32
    %c0_i32_0 = arith.constant 0 : i32
    %c0_i32_1 = arith.constant 0 : i32
    return %c0_i32, %c0_i32_0 : i32, i32
  }
  func.func @transform_12(%arg0: i32, %arg1: i32) -> (i32, i32) {
    %c0_i32 = arith.constant 0 : i32
    %c0_i32_0 = arith.constant 0 : i32
    %c0_i32_1 = arith.constant 0 : i32
    return %c0_i32, %c0_i32_0 : i32, i32
  }
  func.func @transform_13(%arg0: i32, %arg1: i32) -> (i32, i32) {
    %c0_i32 = arith.constant 0 : i32
    %c0_i32_0 = arith.constant 0 : i32
    %c0_i32_1 = arith.constant 0 : i32
    return %c0_i32, %c0_i32_0 : i32, i32
  }
  func.func @transform_14(%arg0: i32, %arg1: i32) -> (i32, i32) {
    %c0_i32 = arith.constant 0 : i32
    %c0_i32_0 = arith.constant 0 : i32
    %c0_i32_1 = arith.constant 0 : i32
    return %c0_i32, %c0_i32_0 : i32, i32
  }
  func.func @transform_15(%arg0: i32, %arg1: i32) -> (i32, i32) {
    %c0_i32 = arith.constant 0 : i32
    %c0_i32_0 = arith.constant 0 : i32
    %c0_i32_1 = arith.constant 0 : i32
    return %c0_i32, %c0_i32_0 : i32, i32
  }
  func.func @transform_16(%arg0: i32, %arg1: i32) -> (i32, i32, i32) {
    %c0_i32 = arith.constant 0 : i32
    %c0_i32_0 = arith.constant 0 : i32
    return %arg0, %arg1, %c0_i32 : i32, i32, i32
  }
}

</mosaic_0001>

<bundles_post_ra>
// kernel: tpu_custom_call.1
= control target key start
LH: loop header
LB: loop body
LE: loop exit
PB: predicated region body
PF: predicated region fallthrough
CT: control target
= control target key end

     0   :  { %s4277_s0 = inlined_call_operand.vmem [shape: f32[2,8,32], index: 0, kind: input, shape index: {}]   ;;  %s4278_s1 = inlined_call_operand.vmem [shape: f32[2,8,32], index: 1, kind: input, shape index: {}]   ;;  %s4279_s2 = inlined_call_operand.vmem [shape: bf16[32,32], index: 2, kind: input, shape index: {}]   ;;  %s4280_s3 = inlined_call_operand.vmem [shape: f32[1,32], index: 3, kind: input, shape index: {}]   ;;  %s4281_s4 = inlined_call_operand.hbm [shape: bf16[32,64], index: 4, kind: input, shape index: {}]   ;;  %s4282_s5 = inlined_call_operand.vmem [shape: f32[1,64], index: 5, kind: input, shape index: {}]   ;;  %s4283_s6 = inlined_call_operand.hbm [shape: bf16[32,32], index: 6, kind: input, shape index: {}]   ;;  %s4284_s7 = inlined_call_operand.hbm [shape: f32[1,32], index: 7, kind: input, shape index: {}]   ;;  %s4285_s8 = inlined_call_operand.hbm [shape: f32[1,32], index: 8, kind: input, shape index: {}]   ;;  %s4286_s9 = inlined_call_operand.hbm [shape: f32[1,32], index: 9, kind: input, shape index: {}]   ;;  %s4287_s10 = inlined_call_operand.vmem [shape: bf16[32,64], index: 10, kind: input, shape index: {}]   ;;  %s4288_s11 = inlined_call_operand.vmem [shape: f32[1,64], index: 11, kind: input, shape index: {}]   ;;  %s4289_s12 = inlined_call_operand.vmem [shape: bf16[64,32], index: 12, kind: input, shape index: {}]   ;;  %s4290_s13 = inlined_call_operand.vmem [shape: f32[1,32], index: 13, kind: input, shape index: {}]   ;;  %s4291_s14 = inlined_call_operand.vmem [shape: f32[1,32], index: 14, kind: input, shape index: {}]   ;;  %s4292_s15 = inlined_call_operand.vmem [shape: f32[1,32], index: 15, kind: input, shape index: {}]   ;;  %s4293_s16 = inlined_call_operand.hbm [shape: f32[2,8,32], index: 16, kind: output, shape index: {}]  }
   0x1   :  { %4311 = sst [smem:[#allocation25_spill]] %s4277_s0 }
   0x2   :  { %4312 = sst [smem:[#allocation26_spill]] %s4291_s14 }
   0x3   :  { %4313 = sst [smem:[#allocation27_spill]] %s4292_s15 }
   0x4   :  { %4314 = sst [smem:[#allocation28_spill]] %s4293_s16 }
   0x5   :  { %21 = vsyncpa [#allocation3], 0 }
   0x6   :  { %22 = vsyncpa [#allocation6], 0 }
   0x7   :  { %23 = vsyncpa [#allocation9], 0 }
   0x8   :  { %24 = vsyncpa [#allocation4], 0 }
   0x9   :  { %26 = vsyncpa [#allocation4 + $0x1], 0  ;;  %s3727_s21 = smov 0   ;;  %s3729_s22 = smov 0  }
   0xa   :  { %s3731_s23 = smov 0   ;;  %s3733_s24 = smov 0  }
   0xb   :  { %s3735_s25 = smov 0   ;;  %s3737_s26 = smov 0  }
   0xc LB: > { %4315 = sst [smem:[#allocation16_spill]] %s3600_s21  ;;  %s3050_s27 = sadd.s32 4294967295, %s3620_s26   ;;  %s3620_s26 = sphi %s3737_s26, %s32_s26   ;;  %s3616_s25 = sphi %s3735_s25, %s4349_s25   ;;  %s3612_s24 = sphi %s3733_s24, %s4348_s24   ;;  %s3608_s23 = sphi %s3731_s23, %s4347_s23   ;;  %s3604_s22 = sphi %s3729_s22, %s4346_s22   ;;  %s3600_s21 = sphi %s3727_s21, %s4345_s21  }
   0xd   : > { %4316 = sst [smem:[#allocation17_spill]] %s3604_s22  ;;  %s3051_s28 = sadd.s32 4294967294, %s3620_s26  }
   0xe   : > { %4317 = sst [smem:[#allocation18_spill]] %s3608_s23  ;;  %s44_s29 = sadd.s32 1, %s3616_s25 }
   0xf   : > { %4318 = sst [smem:[#allocation19_spill]] %s3616_s25  ;;  %s401_s30 = sadd.s32 1, %s3608_s23 }
  0x10   : > { %4319 = sst [smem:[#allocation20_spill]] %s3620_s26  ;;  %p46_p0 = scmp.ge.s32.totalorder %s44_s29, 2 }
  0x11   : > { %p411_p1 = scmp.ne.s32.totalorder %s3608_s23, %s3604_s22  ;;  %p412_p2 = scmp.eq.s32.totalorder %s3050_s27, 1 }
  0x12   : > { %p417_p3 = scmp.ne.s32.totalorder %s3604_s22, %s3600_s21  ;;  %s4351_s29 = smov (%p46_p0, %s44_s29), 0 }
  0x13   : > { %4320 = sst [smem:[#allocation21_spill]] %s4351_s29  ;;  %p3767_p4 = por %p412_p2, %p411_p1 }
  0x14   : > { %p418_p5 = scmp.eq.s32.totalorder %s3051_s28, 1  ;;  %s396_s17 = ssub.s32 %s3616_s25, %s4351_s29 }
  0x15   : > { %s4321_s0 = scalar_select %p3767_p4, 1, 0 }
  0x16   : > { %p3052_p6 = scmp.ge.s32.totalorder %s3620_s26, 1  ;;  %p399_p7 = scmp.eq.s32.totalorder %s396_s17, 0 }
  0x17   : > { %4322 = sst [smem:[#allocation22_spill]] %s4321_s0  ;;  %p3774_p8 = por %p418_p5, %p417_p3 }
  0x18   : > { %p425_p9 = scmp.lt.s32.totalorder %s3620_s26, 3  ;;  %p3786_p11 = scmp.eq.s32.totalorder %s3050_s27, 0 }
  0x19   : > { %s4323_s18 = scalar_select %p3774_p8, 1, 0 }
  0x1a   : > { %s3780_s19 = scalar_select %p399_p7, %s3608_s23, %s401_s30  }
  0x1b   : > { %4324 = sst [smem:[#allocation23_spill]] %s4323_s18  ;;  %p3782_p10 = pnand %p3052_p6, %p425_p9 }
  0x1c   : > { %4325 = sst [smem:[#allocation24_spill]] %s3780_s19  ;;  %s3622_s28 = smov [#allocation5]  }
  0x1d   : > { %s4326_s20 = scalar_select %p3782_p10, 1, 0 }
  0x1e   : > { %s4327_s21 = scalar_select %p3786_p11, 1, 0 }
  0x1f   : > { %p3259_p12 = pneg %p3782_p10  ;;  %s459_s17 = sshll.u32 %s3622_s28, 4  ;;  %s460_s17 = int_to_ptr.vmem [resolvable:$true] %s459_s17 }
  0x20   : > { %s3623_s30 = smov [#allocation8]   ;;  %s3390_s23 = scalar_lea.hbm %s4283_s6, 256 }
  0x21   : > { %p3794_p13 = pnand %p3786_p11, %p3259_p12  ;;  %s484_s25 = sshll.u32 %s3623_s30, 4  ;;  %s3798_s25 = int_to_ptr.vmem [resolvable:$true] %s484_s25 }
  0x22   : > { %p3391_p0 = scmp.ne.s32.totalorder %s4283_s6, %s3390_s23  ;;  %p3397_p5 = scmp.lt.u32.totalorder %s3390_s23, %s4283_s6 }
  0x23   : > { %p3808_p1 = pneg %p3794_p13 }
  0x25   : > { %p3393_p2 = pnand %p3808_p1, %p3391_p0 }
  0x27   : > { %p3394_p3 = pneg %p3393_p2 }
  0x29   : > { %p3399_p6 = pnand %p3397_p5, %p3394_p3 }
  0x2b   : > { %3402 = shalt.err (!%p3399_p6)
}
  0x2c   : > { %s3403_s19 = scalar_lea.vmem %s460_s17, 256  ;;  %p3411_p8 = scmp.lt.s32.totalorder %s460_s17, %s460_s17 }
  0x2d   : > { %p3404_p7 = scmp.ne.s32.totalorder %s460_s17, %s3403_s19  ;;  %p3412_p4 = scmp.lt.s32.totalorder %s3403_s19, %s3403_s19 }
  0x2f   : > { %p3406_p9 = pnand %p3404_p7, %p3808_p1  ;;  %p3413_p11 = por %p3412_p4, %p3411_p8 }
  0x31   : > { %p3407_p12 = pneg %p3406_p9 }
  0x33   : > { %p3414_p10 = pnand %p3413_p11, %p3407_p12 }
  0x35   : > { %3417 = shalt.err (!%p3414_p10)
}
  0x36   : > { %s4309_s26 = smov 64   ;;  %s4310_s18 = smov 4  }
  0x37   : > { %3265 = dma.hbm_to_vmem [thread:$0]  (!%p3794_p13), %s4283_s6, 256, %s460_s17, [#allocation6], %s4309_s26, %s4309_s26, %s4310_s18  }
  0x38   : > { %s3418_s15 = scalar_lea.hbm %s4285_s8, 16 }
  0x39   : > { %p3419_p4 = scmp.ne.s32.totalorder %s4285_s8, %s3418_s15  ;;  %p3425_p11 = scmp.lt.u32.totalorder %s3418_s15, %s4285_s8 }
  0x3b   : > { %p3421_p8 = pnand %p3419_p4, %p3808_p1 }
  0x3d   : > { %p3422_p10 = pneg %p3421_p8 }
  0x3f   : > { %p3427_p0 = pnand %p3425_p11, %p3422_p10 }
  0x41   : > { %3430 = shalt.err (!%p3427_p0)
}
  0x42   : > { %s3431_s17 = scalar_lea.vmem %s3798_s25, 16  ;;  %s3438_s14 = scalar_lea.vmem %s3798_s25, 32 }
  0x43   : > { %p3432_p2 = scmp.ne.s32.totalorder %s3798_s25, %s3431_s17  ;;  %p3439_p6 = scmp.lt.s32.totalorder %s3798_s25, %s3798_s25 }
  0x44   : > { %p3440_p7 = scmp.lt.s32.totalorder %s3438_s14, %s3431_s17 }
  0x45   : > { %p3434_p3 = pnand %p3432_p2, %p3808_p1 }
  0x46   : > { %p3441_p9 = por %p3440_p7, %p3439_p6 }
  0x47   : > { %p3435_p5 = pneg %p3434_p3 }
  0x49   : > { %p3442_p12 = pnand %p3441_p9, %p3435_p5 }
  0x4b   : > { %3445 = shalt.err (!%p3442_p12)
}
  0x4c   : > { %3271 = dma.hbm_to_vmem [thread:$0]  (!%p3794_p13), %s4285_s8, 16, %s3798_s25, [#allocation9]  }
  0x4d   : > { %s3626_s0 = smov [#allocation2]   ;;  %s3627_s23 = smov [#allocation7]  }
  0x4e   : > { %s443_s16 = sshll.u32 %s3626_s0, 4  ;;  %s473_s27 = sshll.u32 %s3627_s23, 4  ;;  %s444_s16 = int_to_ptr.vmem [resolvable:$true] %s443_s16  ;;  %s474_s27 = int_to_ptr.vmem [resolvable:$true] %s473_s27 }
  0x4f   : > { %s3446_s17 = scalar_lea.hbm %s4281_s4, 256 }
  0x50   : > { %p3447_p4 = scmp.ne.s32.totalorder %s4281_s4, %s3446_s17  ;;  %p3453_p11 = scmp.lt.u32.totalorder %s3446_s17, %s4281_s4 }
  0x52   : > { %p3449_p8 = pnand %p3447_p4, %p3808_p1 }
  0x54   : > { %p3450_p10 = pneg %p3449_p8 }
  0x56   : > { %p3455_p0 = pnand %p3453_p11, %p3450_p10 }
  0x58   : > { %3458 = shalt.err (!%p3455_p0)
}
  0x59   : > { %s3459_s25 = scalar_lea.vmem %s444_s16, 256  ;;  %p3467_p6 = scmp.lt.s32.totalorder %s444_s16, %s444_s16 }
  0x5a   : > { %p3460_p2 = scmp.ne.s32.totalorder %s444_s16, %s3459_s25  ;;  %p3468_p7 = scmp.lt.s32.totalorder %s3459_s25, %s3459_s25 }
  0x5c   : > { %p3462_p3 = pnand %p3460_p2, %p3808_p1  ;;  %p3469_p9 = por %p3468_p7, %p3467_p6 }
  0x5e   : > { %p3463_p5 = pneg %p3462_p3 }
  0x60   : > { %p3470_p12 = pnand %p3469_p9, %p3463_p5 }
  0x62   : > { %3473 = shalt.err (!%p3470_p12)
}
  0x63   : > { %s4330_s26 = smov 4   ;;  %s4331_s22 = smov 64  }
  0x64   : > { %3262 = dma.hbm_to_vmem [thread:$0]  (!%p3794_p13), %s4281_s4, 256, %s444_s16, [#allocation3], %s4331_s22, %s4331_s22, %s4330_s26  }
  0x65   : > { %s3474_s19 = scalar_lea.hbm %s4284_s7, 16 }
  0x66   : > { %p3475_p4 = scmp.ne.s32.totalorder %s4284_s7, %s3474_s19  ;;  %p3481_p11 = scmp.lt.u32.totalorder %s3474_s19, %s4284_s7 }
  0x68   : > { %p3477_p8 = pnand %p3475_p4, %p3808_p1 }
  0x6a   : > { %p3478_p10 = pneg %p3477_p8 }
  0x6c   : > { %p3483_p0 = pnand %p3481_p11, %p3478_p10 }
  0x6e   : > { %3486 = shalt.err (!%p3483_p0)
}
  0x6f   : > { %s3487_s18 = scalar_lea.vmem %s474_s27, 16  ;;  %s3494_s16 = scalar_lea.vmem %s474_s27, 32 }
  0x70   : > { %p3488_p2 = scmp.ne.s32.totalorder %s474_s27, %s3487_s18  ;;  %p3495_p6 = scmp.lt.s32.totalorder %s474_s27, %s474_s27 }
  0x71   : > { %p3496_p7 = scmp.lt.s32.totalorder %s3494_s16, %s3487_s18 }
  0x72   : > { %p3490_p3 = pnand %p3488_p2, %p3808_p1 }
  0x73   : > { %p3497_p9 = por %p3496_p7, %p3495_p6 }
  0x74   : > { %p3491_p5 = pneg %p3490_p3 }
  0x76   : > { %p3498_p12 = pnand %p3497_p9, %p3491_p5 }
  0x78   : > { %3501 = shalt.err (!%p3498_p12)
}
  0x79   : > { %3268 = dma.hbm_to_vmem [thread:$0]  (!%p3794_p13), %s4284_s7, 16, %s474_s27, [#allocation6]  }
  0x7a   : > { %s3628_s0 = smov [#allocation10]   ;;  %s3502_s17 = scalar_lea.hbm %s4286_s9, 16 }
  0x7b   : > { %s495_s23 = sshll.u32 %s3628_s0, 4  ;;  %p3503_p4 = scmp.ne.s32.totalorder %s4286_s9, %s3502_s17  ;;  %s496_s23 = int_to_ptr.vmem [resolvable:$true] %s495_s23 }
  0x7c   : > { %p3509_p11 = scmp.lt.u32.totalorder %s3502_s17, %s4286_s9 }
  0x7d   : > { %p3505_p8 = pnand %p3503_p4, %p3808_p1 }
  0x7f   : > { %p3506_p10 = pneg %p3505_p8 }
  0x81   : > { %p3511_p0 = pnand %p3509_p11, %p3506_p10 }
  0x83   : > { %3514 = shalt.err (!%p3511_p0)
}
  0x84   : > { %s3515_s27 = scalar_lea.vmem %s496_s23, 16  ;;  %s3522_s16 = scalar_lea.vmem %s496_s23, 32 }
  0x85   : > { %p3516_p2 = scmp.ne.s32.totalorder %s496_s23, %s3515_s27  ;;  %p3523_p6 = scmp.lt.s32.totalorder %s496_s23, %s496_s23 }
  0x86   : > { %p3524_p7 = scmp.lt.s32.totalorder %s3522_s16, %s3515_s27 }
  0x87   : > { %p3518_p3 = pnand %p3516_p2, %p3808_p1 }
  0x88   : > { %p3525_p9 = por %p3524_p7, %p3523_p6 }
  0x89   : > { %p3519_p5 = pneg %p3518_p3 }
  0x8b   : > { %p3526_p12 = pnand %p3525_p9, %p3519_p5 }
  0x8d   : > { %3529 = shalt.err (!%p3526_p12)
}
  0x8e   : > { %3274 = dma.hbm_to_vmem [thread:$0]  (!%p3794_p13), %s4286_s9, 16, %s496_s23, [#allocation9]  }
  0x8f   : > { %p4332_p4 = scmp.ne.s32.totalorder %s4326_s20, 0 }
  0x90   : > { %p4333_p8 = scmp.ne.s32.totalorder (!%p4332_p4), %s4327_s21, 0 }
  0x91   : > { %543 = sbr.rel (%p4332_p4) target bundleno = 3351 (0xd17), region = 84 }
  0x98   : > { %3583 = dma.done.wait (%p4333_p8), [#allocation3], 256  }
  0x99   : > { %3585 = vsyncadd (%p4333_p8), [#allocation3], 4294967040 }
  0x9a   : > { %3587 = dma.done.wait (%p4333_p8), [#allocation6], 272  }
  0x9b   : > { %3589 = vsyncadd (%p4333_p8), [#allocation6], 4294967024 }
  0x9c   : > { %3591 = dma.done.wait (%p4333_p8), [#allocation9], 32  }
  0x9d   : > { %3593 = vsyncadd (%p4333_p8), [#allocation9], 4294967264  ;;  %p615_p13 = scmp.lt.s32.totalorder %s3612_s24, 1  ;;  %v3629_v0 = vmov 0.0   ;;  %vm3630_vm0 = vmmov 0   ;;  %s4334_s0 = sld [smem:[#allocation25_spill]]  ;;  %v779_v21 = vlaneseq }
  0x9e   : > { %3145 = vmatprep.subr.bf16.mxu1 %v3629_v0  ;;  %3149 = vmatprep.mubr.msk.bf16.mxu1 %vm3630_vm0, %v3629_v0  ;;  %v3357_v1 = vld [vmem:[%s4279_s2] sm:$0xff]   ;;  %v3358_v2 = vld [vmem:[%s4279_s2 + $0x8] sm:$0xff]   ;;  %vm654_vm1 = vcmask 261120   ;;  %s3631_s26 = smov 104   ;;  %s3632_s22 = smov 120   ;;  %vm1500_vm2 = vcmask 1043456  }
  0x9f   : > { %s616_s29 = scalar_select %p615_p13, %s3612_s24, 1  ;;  %3161 = vmatprep.subr.bf16.mxu0 %v3629_v0  ;;  %3163 = vmatprep.mubr.msk.bf16.mxu0 %vm3630_vm0, %v3629_v0  ;;  %v3359_v4 = vld [vmem:[#allocation2] sm:$0xff]   ;;  %v3360_v6 = vld [vmem:[#allocation2 + $0x8] sm:$0xff]   ;;  %v3634_v19 = vmov 1983009808   ;;  %v780_v25 = vshrl.u32 %v779_v21, 7 }
  0xa0   : > { %3146 = vmatpush3.bf16.msra.mxu1 %v3357_v1  ;;  %v3072_v13 = vld [vmem:[%s4282_s5] ss:$0 sm:$0xff]  ;;  %v777_v20 = vunpack.c.l.s4 %v3634_v19  ;;  %v3635_v22 = vmov 1934713408   ;;  %s3637_s21 = smov 96   ;;  %vm1496_vm3 = vcmask 64512  }
  0xa1   : > { %s3066_s20 = sshll.u32 %s616_s29, 3  ;;  %3147 = vmatprep.subr.bf16.mxu1 %v3629_v0  ;;  %s3633_s29 = smov 112   ;;  %v809_v23 = vunpack.c.l.s4 %v3635_v22  ;;  %v3068_v60 = vld [vmem:[%s4280_s3] ss:$0 sm:$0xff]  ;;  %vm2617_vm4 = vcmask 130048   ;;  %vm2619_vm5 = vcmask 195584  }
  0xa2   : > { %s625_s18 = scalar_lea.vmem %s4278_s1, %s3066_s20  ;;  %v778_v24 = vunpack.c.0.s8 %v777_v20  ;;  %s3639_s30 = smov 8   ;;  %vm2827_vm6 = vcmask 523264  }
  0xa3   : > { %s3933_s23 = scalar_lea.vmem %s4334_s0, %s3066_s20  ;;  %v628_v7 = vld [vmem:[%s625_s18] sm:$0xff]  ;;  %v810_v28 = vunpack.c.0.s8 %v809_v23  ;;  %s3638_s0 = smov 16  }
  0xa4   : > { %v627_v3 = vld [vmem:[%s3933_s23] sm:$0xff]  ;;  %3148 = vmatpush3.bf16.msra.mxu1 %v3358_v2  ;;  %v630_v8 = vpack.c.bf16 %v628_v7, %v628_v7  ;;  %v3972_v29 = vsub.s32 %v778_v24, %v780_v25  ;;  %s3640_s19 = smov 24   ;;  %s4336_s15 = sld [smem:[#allocation22_spill]] }
  0xa5   : > { %v629_v5 = vpack.c.bf16 %v627_v3, %v627_v3  ;;  %3153 = vmatprep.subr.bf16.mxu1 %v3629_v0  ;;  %v3984_v35 = vsub.s32 %v810_v28, %v780_v25  ;;  %s4337_s18 = sld [smem:[#allocation26_spill]] }
  0xa7   : > { %3150 = vmatmul.mubr.msk.bf16.vlgmr.msra.gmra.mrb[0].mxu1 %vm654_vm1, %v629_v5 }
  0xa8   : > { %3154 = vmatpush3.bf16.msra.mxu1 %v3359_v4  ;;  %3157 = vmatprep.mubr.msk.bf16.mxu1 %vm3630_vm0, %v3629_v0 }
  0xa9   : > { %3155 = vmatprep.subr.bf16.mxu1 %v3629_v0 }
  0xaa   : > { %p4340_p10 = scmp.ne.s32.totalorder %s4336_s15, 0 }
  0xac   : > { %3156 = vmatpush3.bf16.msra.mxu1 %v3360_v6 }
  0xad   : > { %3167 = vmatprep.subr.bf16.mxu1 %v3629_v0 }
  0xaf   : > { %3158 = vmatmul.mubr.msk.bf16.vlgmr.msra.gmra.mrb[4].mxu1 %vm654_vm1, %v630_v8 }
  0xb0   : > { %3169 = vmatprep.mubr.msk.bf16.mxu1 %vm3630_vm0, %v3629_v0 }
 0x17a   : > { %v3955_v9 = vpop.f32.mrb[0].mxu1 }
 0x17b   : > { %v3151_v10 = vpop.f32.mrb[1].mxu1  ;;  %v4002_v61 = vadd.f32 %v3068_v60, %v3955_v9 }
 0x17c   : > { %v695_v11 = vpop.f32.mrb[2].mxu1 }
 0x17d   : > { %v3152_v12 = vpop.f32.mrb[3].mxu1 }
 0x182   : > { %v758_v14 = vpop.f32.mrb[4].mxu1 }
 0x183   : > { %v3960_v15 = vadd.f32 %v3072_v13, %v758_v14  ;;  %v3159_v16 = vpop.f32.mrb[5].mxu1 }
 0x184   : > { %v761_v17 = vpop.f32.mrb[6].mxu1 }
 0x185   : > { %849 = vrot.lane.b32.xlu1 %v3960_v15, %s3631_s26  ;;  %843 = vrot.lane.b32.xlu0 %v3960_v15, %s3632_s22  ;;  %v3160_v18 = vpop.f32.mrb[7].mxu1 }
 0x189   : > { %846 = vrot.lane.b32.xlu0 %v3960_v15, %s3633_s29 }
 0x1f7   : > { %v3968_v26 = vpop.permute.xlu1 %849  ;;  %v3970_v27 = vpop.permute.xlu0 %843 }
 0x1f8   : > { %v868_v30 = vcombine.low %v3970_v27, %v3968_v26  ;;  %v869_v31 = vcombine.high %v3970_v27, %v3968_v26 }
 0x1fa   : > { %v876_v36 = vrot.slane %v868_v30, %v3972_v29  ;;  %v883_v37 = vrot.slane %v869_v31, %v3972_v29  ;;  %v3636_v30 = vmov 0  }
 0x1fb   : > { %v3978_v32 = vpop.permute.xlu0 %846 }
 0x1fc   : > { %v852_v33 = vcombine.low %v3960_v15, %v3978_v32  ;;  %v853_v34 = vcombine.high %v3960_v15, %v3978_v32 }
 0x1fe   : > { %v860_v38 = vrot.slane %v852_v33, %v3972_v29  ;;  %v867_v39 = vrot.slane %v853_v34, %v3972_v29 }
 0x200   : > { %v885_v40 = vcombine.high %v860_v38, %v876_v36  ;;  %v884_v41 = vcombine.low %v860_v38, %v876_v36  ;;  %v900_v42 = vcombine.low %v867_v39, %v883_v37  ;;  %v901_v45 = vcombine.high %v867_v39, %v883_v37 }
 0x202   : > { %v899_v43 = vrot.slane %v885_v40, %v3984_v35  ;;  %v892_v44 = vrot.slane %v884_v41, %v3984_v35  ;;  %v908_v48 = vrot.slane %v900_v42, %v3984_v35  ;;  %v915_v52 = vrot.slane %v901_v45, %v3984_v35 }
 0x204   : > { %v1010_v46 = vpack.c.bf16 %v899_v43, %v899_v43  ;;  %v1008_v47 = vpack.c.bf16 %v892_v44, %v892_v44  ;;  %v917_v49 = vcombine.high %v899_v43, %v3629_v0  ;;  %v1012_v50 = vpack.c.bf16 %v908_v48, %v908_v48 }
 0x205   : > { %v918_v53 = vcombine.high %v908_v48, %v3629_v0  ;;  %v1014_v54 = vpack.c.bf16 %v915_v52, %v915_v52  ;;  %v919_v56 = vcombine.high %v915_v52, %v3629_v0  ;;  %v916_v57 = vcombine.high %v892_v44, %v3629_v0 }
 0x206   : > { %1110 = vxpose.xlu0.c.b16.start.end [1/1] (short) (narrow) %v1010_v46, 16  ;;  %1078 = vxpose.xlu1.c.b16.start.end [1/1] (short) (narrow) %v1008_v47, 16  ;;  %v1011_v51 = vpack.c.bf16 %v917_v49, %v917_v49 }
 0x207   : > { %v1013_v55 = vpack.c.bf16 %v918_v53, %v918_v53  ;;  %v1015_v58 = vpack.c.bf16 %v919_v56, %v919_v56  ;;  %v1009_v59 = vpack.c.bf16 %v916_v57, %v916_v57 }
 0x20a   : > { %1142 = vxpose.xlu0.c.b16.start.end [1/1] (short) (narrow) %v1012_v50, 16  ;;  %1126 = vxpose.xlu1.c.b16.start.end [1/1] (short) (narrow) %v1011_v51, 16 }
 0x20e   : > { %1174 = vxpose.xlu0.c.b16.start.end [1/1] (short) (narrow) %v1014_v54, 16  ;;  %1158 = vxpose.xlu1.c.b16.start.end [1/1] (short) (narrow) %v1013_v55, 16 }
 0x212   : > { %1190 = vxpose.xlu1.c.b16.start.end [1/1] (short) (narrow) %v1015_v58, 16  ;;  %1094 = vxpose.xlu0.c.b16.start.end [1/1] (short) (narrow) %v1009_v59, 16 }
 0x216   : > { %768 = vrot.lane.b32.xlu1 %v4002_v61, %s3633_s29 }
 0x21a   : > { %771 = vrot.lane.b32.xlu1 %v4002_v61, %s3631_s26  ;;  %s4338_s26 = sld [smem:[#allocation27_spill]] }
 0x21b   : > { %765 = vrot.lane.b32.xlu0 %v4002_v61, %s3632_s22  ;;  %s3109_s22 = sshll.u32 %s3612_s24, 7  ;;  %s3641_s24 = smov [#allocation11]  }
 0x26c   : > { %v1118_v62 = vpop.trf.xlu0  ;;  %v1086_v63 = vpop.trf.xlu1 }
 0x270   : > { %v1150_v1 = vpop.trf.xlu0  ;;  %v1134_v2 = vpop.trf.xlu1 }
 0x271   : > { %v1206_v5 = vcombine.low %v1086_v63, %v1150_v1 }
 0x273   : > { %v1213_v10 = vrot.slane %v1206_v5, %v3972_v29 }
 0x274   : > { %v1182_v3 = vpop.trf.xlu0  ;;  %v1166_v4 = vpop.trf.xlu1 }
 0x275   : > { %v1214_v6 = vcombine.low %v1118_v62, %v1182_v3 }
 0x277   : > { %v1221_v7 = vrot.slane %v1214_v6, %v3972_v29 }
 0x278   : > { %v1198_v8 = vpop.trf.xlu1  ;;  %v1102_v9 = vpop.trf.xlu0 }
 0x279   : > { %v1248_v11 = vcombine.low %v1134_v2, %v1198_v8  ;;  %v1240_v12 = vcombine.low %v1102_v9, %v1166_v4  ;;  %v1222_v13 = vcombine.low %v1213_v10, %v1221_v7  ;;  %v1223_v14 = vcombine.high %v1213_v10, %v1221_v7 }
 0x27b   : > { %v1255_v16 = vrot.slane %v1248_v11, %v3972_v29  ;;  %v1247_v17 = vrot.slane %v1240_v12, %v3972_v29  ;;  %v1230_v20 = vrot.slane %v1222_v13, %v3984_v35  ;;  %v1237_v21 = vrot.slane %v1223_v14, %v3984_v35 }
 0x27d   : > { %v1256_v18 = vcombine.low %v1247_v17, %v1255_v16  ;;  %v1257_v19 = vcombine.high %v1247_v17, %v1255_v16  ;;  %v1278_v33 = vshrl.u32 %v1230_v20, 16  ;;  %v1238_v34 = vcombine.high %v1230_v20, %v3636_v30 }
 0x27e   : > { %v1239_v40 = vcombine.high %v1237_v21, %v3636_v30  ;;  %v1294_v41 = vshrl.u32 %v1237_v21, 16 }
 0x27f   : > { %v1264_v22 = vrot.slane %v1256_v18, %v3984_v35  ;;  %v1271_v23 = vrot.slane %v1257_v19, %v3984_v35  ;;  %v1286_v45 = vshrl.u32 %v1238_v34, 16 }
 0x280   : > { %v1302_v48 = vshrl.u32 %v1239_v40, 16 }
 0x281   : > { %v1292_v24 = vpack.i.b16 %v1271_v23, %v1237_v21  ;;  %v1276_v25 = vpack.i.b16 %v1264_v22, %v1230_v20  ;;  %v1279_v28 = vshrl.u32 %v1264_v22, 16  ;;  %v1272_v31 = vcombine.high %v1264_v22, %v3636_v30 }
 0x282   : > { %v1273_v38 = vcombine.high %v1271_v23, %v3636_v30  ;;  %v1295_v39 = vshrl.u32 %v1271_v23, 16 }
 0x283   : > { %1370 = vxpose.xlu1.c.b16.start.end [1/1] (short) (narrow) %v1292_v24, 16  ;;  %1306 = vxpose.xlu0.c.b16.start.end [1/1] (short) (narrow) %v1276_v25, 16  ;;  %v1280_v36 = vpack.i.b16 %v1279_v28, %v1278_v33  ;;  %v1284_v37 = vpack.i.b16 %v1272_v31, %v1238_v34  ;;  %v1287_v44 = vshrl.u32 %v1272_v31, 16 }
 0x284   : > { %v1300_v42 = vpack.i.b16 %v1273_v38, %v1239_v40  ;;  %v1296_v43 = vpack.i.b16 %v1295_v39, %v1294_v41  ;;  %v1303_v47 = vshrl.u32 %v1273_v38, 16 }
 0x285   : > { %v1288_v46 = vpack.i.b16 %v1287_v44, %v1286_v45 }
 0x286   : > { %v1304_v49 = vpack.i.b16 %v1303_v47, %v1302_v48 }
 0x287   : > { %1322 = vxpose.xlu1.c.b16.start.end [1/1] (short) (narrow) %v1280_v36, 16  ;;  %1338 = vxpose.xlu0.c.b16.start.end [1/1] (short) (narrow) %v1284_v37, 16 }
 0x288   : > { %v769_v50 = vpop.permute.xlu1 %768 }
 0x289   : > { %v774_v55 = vcombine.low %v4002_v61, %v769_v50  ;;  %v775_v56 = vcombine.high %v4002_v61, %v769_v50 }
 0x28b   : > { %1402 = vxpose.xlu1.c.b16.start.end [1/1] (short) (narrow) %v1300_v42, 16  ;;  %1386 = vxpose.xlu0.c.b16.start.end [1/1] (short) (narrow) %v1296_v43, 16  ;;  %v782_v58 = vrot.slane %v774_v55, %v3972_v29 }
 0x28c   : > { %v772_v51 = vpop.permute.xlu1 %771 }
 0x28d   : > { %v766_v52 = vpop.permute.xlu0 %765 }
 0x28e   : > { %v790_v53 = vcombine.low %v766_v52, %v772_v51  ;;  %v791_v54 = vcombine.high %v766_v52, %v772_v51 }
 0x28f   : > { %920 = vrot.lane.b32.xlu1 %v3960_v15, %s3637_s21  ;;  %1354 = vxpose.xlu0.c.b16.start.end [1/1] (short) (narrow) %v1288_v46, 16 }
 0x290   : > { %v798_v15 = vrot.slane %v790_v53, %v3972_v29  ;;  %v805_v57 = vrot.slane %v791_v54, %v3972_v29 }
 0x292   : > { %v806_v59 = vcombine.low %v782_v58, %v798_v15  ;;  %v807_v60 = vcombine.high %v782_v58, %v798_v15 }
 0x293   : > { %924 = vrot.lane.b32.xlu1 %v3978_v32, %s3637_s21  ;;  %1418 = vxpose.xlu0.c.b16.start.end [1/1] (short) (narrow) %v1304_v49, 16  ;;  %v789_v32 = vrot.slane %v775_v56, %v3972_v29 }
 0x294   : > { %v814_v2 = vrot.slane %v806_v59, %v3984_v35  ;;  %v821_v3 = vrot.slane %v807_v60, %v3984_v35 }
 0x295   : > { %v823_v62 = vcombine.high %v789_v32, %v805_v57 }
 0x296   : > { %v838_v7 = vcombine.high %v814_v2, %v3629_v0  ;;  %v839_v8 = vcombine.high %v821_v3, %v3629_v0 }
 0x297   : > { %v837_v4 = vrot.slane %v823_v62, %v3984_v35 }
 0x299   : > { %v841_v10 = vcombine.high %v837_v4, %v3629_v0  ;;  %v3077_v19 = vpack.c.bf16 %v837_v4, %v821_v3 }
 0x29b   : > { %v3079_v16 = vpack.c.bf16 %v841_v10, %v839_v8  ;;  %v1031_v31 = vrot.slane %v3077_v19, %v3972_v29 }
 0x29c   : > { %922 = vrot.lane.b32.xlu0 %v3970_v27, %s3637_s21  ;;  %v822_v27 = vcombine.low %v789_v32, %v805_v57 }
 0x29d   : > { %v1056_v23 = vrot.slane %v3079_v16, %v3972_v29 }
 0x29e   : > { %v830_v61 = vrot.slane %v822_v27, %v3984_v35 }
 0x2a0   : > { %v840_v9 = vcombine.high %v830_v61, %v3629_v0  ;;  %v3076_v18 = vpack.c.bf16 %v830_v61, %v814_v2 }
 0x2a2   : > { %v3078_v14 = vpack.c.bf16 %v840_v9, %v838_v7  ;;  %v1023_v28 = vrot.slane %v3076_v18, %v3972_v29 }
 0x2a4   : > { %v1048_v22 = vrot.slane %v3078_v14, %v3972_v29  ;;  %v1032_v40 = vcombine.low %v1023_v28, %v1031_v31 }
 0x2a6   : > { %v1057_v37 = vcombine.low %v1048_v22, %v1056_v23  ;;  %v1039_v45 = vrot.slane %v1032_v40, %v3984_v35 }
 0x2a8   : > { %v1064_v43 = vrot.slane %v1057_v37, %v3984_v35  ;;  %v1069_v58 = vshrl.u32 %v1039_v45, 16 }
 0x2aa   : > { %v1070_v51 = vshrl.u32 %v1064_v43, 16  ;;  %v1068_v57 = vpack.i.b16 %v1064_v43, %v1039_v45  ;;  %v1065_v27 = vcombine.high %v1064_v43, %v3636_v30 }
 0x2ac   : > { %v1071_v60 = vpack.i.b16 %v1070_v51, %v1069_v58 }
 0x2e9   : > { %v1378_v63 = vpop.trf.xlu1  ;;  %v1314_v1 = vpop.trf.xlu0 }
 0x2ea   : > { %v1434_v17 = vcombine.low %v1314_v1, %v1378_v63  ;;  %v1040_v63 = vcombine.high %v1039_v45, %v3636_v30  ;;  %v1076_v1 = vshrl.u32 %v1065_v27, 16 }
 0x2ec   : > { %v1441_v24 = vrot.slane %v1434_v17, %v3972_v29  ;;  %v1074_v2 = vpack.i.b16 %v1065_v27, %v1040_v63  ;;  %v1075_v3 = vshrl.u32 %v1040_v63, 16 }
 0x2ed   : > { %v1330_v5 = vpop.trf.xlu1  ;;  %v1346_v6 = vpop.trf.xlu0 }
 0x2ee   : > { %v1077_v61 = vpack.i.b16 %v1076_v1, %v1075_v3 }
 0x2f1   : > { %v1410_v11 = vpop.trf.xlu1  ;;  %v1394_v12 = vpop.trf.xlu0 }
 0x2f2   : > { %v1442_v13 = vcombine.low %v1346_v6, %v1410_v11  ;;  %v1459_v25 = vcombine.low %v1330_v5, %v1394_v12 }
 0x2f4   : > { %v1449_v20 = vrot.slane %v1442_v13, %v3972_v29  ;;  %v1466_v38 = vrot.slane %v1459_v25, %v3972_v29 }
 0x2f5   : > { %v1362_v21 = vpop.trf.xlu0 }
 0x2f6   : > { %v1450_v33 = vcombine.low %v1441_v24, %v1449_v20 }
 0x2f8   : > { %v1457_v41 = vrot.slane %v1450_v33, %v3984_v35 }
 0x2f9   : > { %v1426_v34 = vpop.trf.xlu0 }
 0x2fa   : > { %v1467_v36 = vcombine.low %v1362_v21, %v1426_v34  ;;  %v1458_v46 = vcombine.high %v1457_v41, %v3636_v30  ;;  %v1487_v48 = vshrl.u32 %v1457_v41, 16 }
 0x2fc   : > { %v1474_v39 = vrot.slane %v1467_v36, %v3972_v29  ;;  %v1493_v56 = vshrl.u32 %v1458_v46, 16 }
 0x2fe   : > { %v1475_v42 = vcombine.low %v1466_v38, %v1474_v39 }
 0x300   : > { %v1482_v44 = vrot.slane %v1475_v42, %v3984_v35 }
 0x301   : > { %v921_v23 = vpop.permute.xlu1 %920 }
 0x302   : > { %v1486_v47 = vpack.i.b16 %v1482_v44, %v1457_v41  ;;  %v1488_v49 = vshrl.u32 %v1482_v44, 16  ;;  %v1483_v50 = vcombine.high %v1482_v44, %v3636_v30 }
 0x304   : > { %v1502_v52 = vsel %vm1500_vm2, %v1486_v47, 0  ;;  %v1489_v53 = vpack.i.b16 %v1488_v49, %v1487_v48  ;;  %v1492_v54 = vpack.i.b16 %v1483_v50, %v1458_v46  ;;  %v1494_v55 = vshrl.u32 %v1483_v50, 16 }
 0x305   : > { %3162 = vmatpush3.bf16.msra.mxu0 %v1502_v52  ;;  %v925_v24 = vpop.permute.xlu1 %924 }
 0x306   : > { %v1548_v15 = vsel %vm1500_vm2, %v1489_v53, 0  ;;  %3173 = vmatprep.subr.bf16.mxu0 %v3629_v0  ;;  %v1495_v32 = vpack.i.b16 %v1494_v55, %v1493_v56  ;;  %v1594_v59 = vsel %vm1500_vm2, %v1492_v54, 0  ;;  %v932_v31 = vcombine.low %v921_v23, %v925_v24 }
 0x307   : > { %3168 = vmatpush3.bf16.msra.mxu1 %v1548_v15  ;;  %v933_v36 = vcombine.high %v921_v23, %v925_v24 }
 0x308   : > { %3164 = vmatmul.mubr.msk.bf16.vlgmr.msra.gmra.mrb[0].mxu0 %vm1496_vm3, %v1068_v57  ;;  %3179 = vmatprep.subr.bf16.mxu1 %v3629_v0  ;;  %v1640_v62 = vsel %vm1500_vm2, %v1495_v32, 0  ;;  %v940_v39 = vrot.slane %v932_v31, %v3972_v29 }
 0x309   : > { %3174 = vmatpush3.bf16.msra.mxu0 %v1594_v59  ;;  %3175 = vmatprep.mubr.msk.bf16.mxu0 %vm3630_vm0, %v3629_v0  ;;  %v947_v41 = vrot.slane %v933_v36, %v3972_v29 }
 0x30a   : > { %3170 = vmatmul.mubr.msk.bf16.vlgmr.msra.gmra.mrb[8].mxu1 %vm1496_vm3, %v1071_v60  ;;  %3185 = vmatprep.subr.bf16.mxu0 %v3629_v0 }
 0x30b   : > { %3180 = vmatpush3.bf16.msra.mxu1 %v1640_v62  ;;  %3181 = vmatprep.mubr.msk.bf16.mxu1 %vm3630_vm0, %v3629_v0 }
 0x30c   : > { %3191 = vmatprep.subr.bf16.mxu1 %v3629_v0 }
 0x30e   : > { %v923_v33 = vpop.permute.xlu0 %922 }
 0x310   : > { %3176 = vmatmul.mubr.msk.bf16.vlgmr.msra.gmra.mrb[4].mxu0 %vm1496_vm3, %v1074_v2 }
 0x311   : > { %3187 = vmatprep.mubr.msk.bf16.mxu0 %vm3630_vm0, %v3629_v0 }
 0x312   : > { %3182 = vmatmul.mubr.msk.bf16.vlgmr.msra.gmra.mrb[12].mxu1 %vm1496_vm3, %v1077_v61 }
 0x313   : > { %3193 = vmatprep.mubr.msk.bf16.mxu1 %vm3630_vm0, %v3629_v0 }
 0x3db   : > { %v4078_v4 = vpop.f32.mrb[0].mxu0 }
 0x3dc   : > { %v3165_v5 = vpop.f32.mrb[1].mxu0  ;;  %v1682_v6 = vsel %vm1496_vm3, %v4078_v4, -inf }
 0x3dd   : > { %1683 = vmax.xlane.f32.xlu1 %v1682_v6  ;;  %v1541_v7 = vpop.f32.mrb[2].mxu0  ;;  %v4082_v8 = vpop.f32.mrb[8].mxu1 }
 0x3de   : > { %v3166_v9 = vpop.f32.mrb[3].mxu0  ;;  %v3171_v10 = vpop.f32.mrb[9].mxu1  ;;  %v1685_v53 = vsel %vm1496_vm3, %v4082_v8, -inf }
 0x3df   : > { %v1587_v11 = vpop.f32.mrb[10].mxu1 }
 0x3e0   : > { %v3172_v12 = vpop.f32.mrb[11].mxu1 }
 0x3e3   : > { %v4084_v13 = vpop.f32.mrb[4].mxu0 }
 0x3e4   : > { %v3177_v14 = vpop.f32.mrb[5].mxu0  ;;  %v1688_v22 = vsel %vm1496_vm3, %v4084_v13, -inf }
 0x3e5   : > { %v1633_v16 = vpop.f32.mrb[6].mxu0  ;;  %v4086_v17 = vpop.f32.mrb[12].mxu1 }
 0x3e6   : > { %v3178_v18 = vpop.f32.mrb[7].mxu0  ;;  %v3183_v19 = vpop.f32.mrb[13].mxu1  ;;  %v1691_v15 = vsel %vm1496_vm3, %v4086_v17, -inf }
 0x3e7   : > { %v1679_v20 = vpop.f32.mrb[14].mxu1 }
 0x3e8   : > { %v3184_v21 = vpop.f32.mrb[15].mxu1 }
 0x3ee   : > { %926 = vrot.lane.b32.xlu1 %v3968_v26, %s3637_s21 }
 0x412   : > { %1689 = vmax.xlane.f32.xlu1 %v1688_v22 }
 0x46a   : > { %v4092_v25 = vpop.xlane.xlu1 %1683 }
 0x46b   : > { %v1694_v28 = vsub.f32 %v4078_v4, %v4092_v25 }
 0x46e   : > { %v927_v34 = vpop.permute.xlu1 %926 }
 0x46f   : > { %v948_v37 = vcombine.low %v923_v33, %v927_v34  ;;  %v949_v38 = vcombine.high %v923_v33, %v927_v34 }
 0x471   : > { %v956_v26 = vrot.slane %v948_v37, %v3972_v29  ;;  %v963_v40 = vrot.slane %v949_v38, %v3972_v29 }
 0x473   : > { %v964_v42 = vcombine.low %v940_v39, %v956_v26  ;;  %v980_v44 = vcombine.low %v947_v41, %v963_v40  ;;  %v981_v49 = vcombine.high %v947_v41, %v963_v40  ;;  %v965_v54 = vcombine.high %v940_v39, %v956_v26 }
 0x475   : > { %v972_v43 = vrot.slane %v964_v42, %v3984_v35  ;;  %v988_v48 = vrot.slane %v980_v44, %v3984_v35  ;;  %v995_v51 = vrot.slane %v981_v49, %v3984_v35  ;;  %v979_v55 = vrot.slane %v965_v54, %v3984_v35 }
 0x477   : > { %v1730_v45 = vpack.c.bf16 %v972_v43, %v972_v43  ;;  %v996_v46 = vcombine.high %v972_v43, %v3629_v0  ;;  %v1734_v50 = vpack.c.bf16 %v988_v48, %v988_v48  ;;  %v1736_v52 = vpack.c.bf16 %v995_v51, %v995_v51 }
 0x478   : > { %v1732_v56 = vpack.c.bf16 %v979_v55, %v979_v55  ;;  %v997_v57 = vcombine.high %v979_v55, %v3629_v0  ;;  %v998_v32 = vcombine.high %v988_v48, %v3629_v0  ;;  %v999_v60 = vcombine.high %v995_v51, %v3629_v0 }
 0x479   : > { %1738 = vxpose.xlu0.c.b16.start.end [1/1] (short) (narrow) %v1730_v45, 16  ;;  %v1731_v47 = vpack.c.bf16 %v996_v46, %v996_v46 }
 0x47a   : > { %v1733_v58 = vpack.c.bf16 %v997_v57, %v997_v57  ;;  %v1735_v59 = vpack.c.bf16 %v998_v32, %v998_v32  ;;  %v1737_v27 = vpack.c.bf16 %v999_v60, %v999_v60 }
 0x47b   : > { %1754 = vxpose.xlu1.c.b16.start.end [1/1] (short) (narrow) %v1731_v47, 16  ;;  %v1698_v47 = vmul.f32 1.442695, %v1694_v28 }
 0x47d   : > { %3369 = vpow2.f32 %v1698_v47 }
 0x47f   : > { %1802 = vxpose.xlu1.c.b16.start.end [1/1] (short) (narrow) %v1734_v50, 16 }
 0x483   : > { %1834 = vxpose.xlu1.c.b16.start.end [1/1] (short) (narrow) %v1736_v52, 16 }
 0x486   : > { %1686 = vmax.xlane.f32.xlu0 %v1685_v53 }
 0x487   : > { %v3370_v4 = vpop.eup %3369 }
 0x488   : > { %v1706_v25 = vsel %vm1496_vm3, %v3370_v4, 0.0 }
 0x49f   : > { %v1690_v62 = vpop.xlane.xlu1 %1689 }
 0x4a0   : > { %v1696_v48 = vsub.f32 %v4084_v13, %v1690_v62 }
 0x4a2   : > { %v1702_v54 = vmul.f32 1.442695, %v1696_v48 }
 0x4b3   : > { %1770 = vxpose.xlu0.c.b16.start.end [1/1] (short) (narrow) %v1732_v56, 16 }
 0x4c0   : > { %1692 = vmax.xlane.f32.xlu0 %v1691_v15 }
 0x4df   : > { %v1746_v63 = vpop.trf.xlu0 }
 0x4e1   : > { %v1762_v1 = vpop.trf.xlu1 }
 0x4e5   : > { %v1810_v3 = vpop.trf.xlu1 }
 0x4e6   : > { %v1866_v7 = vcombine.low %v1746_v63, %v1810_v3 }
 0x4e8   : > { %v1873_v11 = vrot.slane %v1866_v7, %v3972_v29 }
 0x4e9   : > { %v1842_v6 = vpop.trf.xlu1 }
 0x4ed   : > { %1786 = vxpose.xlu0.c.b16.start.end [1/1] (short) (narrow) %v1733_v58, 16 }
 0x4f1   : > { %1818 = vxpose.xlu0.c.b16.start.end [1/1] (short) (narrow) %v1735_v59, 16 }
 0x4f5   : > { %1850 = vxpose.xlu0.c.b16.start.end [1/1] (short) (narrow) %v1737_v27, 16 }
 0x513   : > { %v1687_v2 = vpop.xlane.xlu0 %1686 }
 0x514   : > { %v1695_v43 = vsub.f32 %v4082_v8, %v1687_v2 }
 0x516   : > { %v1700_v51 = vmul.f32 1.442695, %v1695_v43 }
 0x518   : > { %3371 = vpow2.f32 %v1700_v51 }
 0x519   : > { %v1778_v61 = vpop.trf.xlu0  ;;  %3373 = vpow2.f32 %v1702_v54 }
 0x51a   : > { %v1874_v9 = vcombine.low %v1778_v61, %v1842_v6 }
 0x51c   : > { %v1881_v12 = vrot.slane %v1874_v9, %v3972_v29 }
 0x51e   : > { %v1882_v18 = vcombine.low %v1873_v11, %v1881_v12  ;;  %v1883_v34 = vcombine.high %v1873_v11, %v1881_v12 }
 0x520   : > { %v1890_v23 = vrot.slane %v1882_v18, %v3984_v35  ;;  %v1897_v46 = vrot.slane %v1883_v34, %v3984_v35 }
 0x522   : > { %v1938_v36 = vshrl.u32 %v1890_v23, 16  ;;  %v1898_v39 = vcombine.high %v1890_v23, %v3636_v30  ;;  %v1954_v8 = vshrl.u32 %v1897_v46, 16  ;;  %v3372_v13 = vpop.eup %3371  ;;  %v1899_v59 = vcombine.high %v1897_v46, %v3636_v30 }
 0x523   : > { %v3374_v28 = vpop.eup %3373 }
 0x524   : > { %v1946_v45 = vshrl.u32 %v1898_v39, 16  ;;  %v1712_v57 = vsel %vm1496_vm3, %v3374_v28, 0.0  ;;  %v1962_v62 = vshrl.u32 %v1899_v59, 16 }
 0x54d   : > { %v1693_v5 = vpop.xlane.xlu0 %1692 }
 0x54e   : > { %v1697_v52 = vsub.f32 %v4086_v17, %v1693_v5  ;;  %v1709_v17 = vsel %vm1496_vm3, %v3372_v13, 0.0 }
 0x550   : > { %v1704_v56 = vmul.f32 1.442695, %v1697_v52 }
 0x552   : > { %3375 = vpow2.f32 %v1704_v56 }
 0x553   : > { %v1794_v10 = vpop.trf.xlu0 }
 0x557   : > { %v1826_v14 = vpop.trf.xlu0 }
 0x558   : > { %v1900_v16 = vcombine.low %v1762_v1, %v1826_v14 }
 0x55a   : > { %v1907_v21 = vrot.slane %v1900_v16, %v3972_v29 }
 0x55b   : > { %v1858_v19 = vpop.trf.xlu0 }
 0x55c   : > { %v1908_v20 = vcombine.low %v1794_v10, %v1858_v19  ;;  %v3376_v15 = vpop.eup %3375 }
 0x55d   : > { %v1715_v58 = vsel %vm1496_vm3, %v3376_v15, 0.0 }
 0x55e   : > { %v1915_v22 = vrot.slane %v1908_v20, %v3972_v29 }
 0x560   : > { %v1916_v24 = vcombine.low %v1907_v21, %v1915_v22  ;;  %v1917_v31 = vcombine.high %v1907_v21, %v1915_v22 }
 0x562   : > { %v1924_v33 = vrot.slane %v1916_v24, %v3984_v35  ;;  %v1931_v42 = vrot.slane %v1917_v31, %v3984_v35 }
 0x564   : > { %v1936_v37 = vpack.i.b16 %v1924_v33, %v1890_v23  ;;  %v1939_v38 = vshrl.u32 %v1924_v33, 16  ;;  %v1932_v26 = vcombine.high %v1924_v33, %v3636_v30  ;;  %v1955_v50 = vshrl.u32 %v1931_v42, 16 }
 0x565   : > { %v1952_v53 = vpack.i.b16 %v1931_v42, %v1897_v46  ;;  %v1933_v32 = vcombine.high %v1931_v42, %v3636_v30 }
 0x566   : > { %1966 = vxpose.xlu1.c.b16.start.end [1/1] (short) (narrow) %v1936_v37, 16  ;;  %v1940_v40 = vpack.i.b16 %v1939_v38, %v1938_v36  ;;  %v1947_v41 = vshrl.u32 %v1932_v26, 16  ;;  %v1944_v44 = vpack.i.b16 %v1932_v26, %v1898_v39  ;;  %v1956_v55 = vpack.i.b16 %v1955_v50, %v1954_v8 }
 0x567   : > { %v1963_v60 = vshrl.u32 %v1933_v32, 16  ;;  %v1960_v27 = vpack.i.b16 %v1933_v32, %v1899_v59 }
 0x568   : > { %1982 = vxpose.xlu0.c.b16.start.end [1/1] (short) (narrow) %v1940_v40, 16  ;;  %v1948_v49 = vpack.i.b16 %v1947_v41, %v1946_v45 }
 0x569   : > { %v1964_v63 = vpack.i.b16 %v1963_v60, %v1962_v62 }
 0x56a   : > { %1998 = vxpose.xlu1.c.b16.start.end [1/1] (short) (narrow) %v1944_v44, 16 }
 0x56c   : > { %2014 = vxpose.xlu0.c.b16.start.end [1/1] (short) (narrow) %v1948_v49, 16 }
 0x56e   : > { %2030 = vxpose.xlu1.c.b16.start.end [1/1] (short) (narrow) %v1952_v53, 16 }
 0x570   : > { %2046 = vxpose.xlu0.c.b16.start.end [1/1] (short) (narrow) %v1956_v55, 16 }
 0x57b   : > { %1707 = vadd.xlane.f32.xlu1 %v1706_v25 }
 0x57d   : > { %1710 = vadd.xlane.f32.xlu0 %v1709_v17 }
 0x57f   : > { %1713 = vadd.xlane.f32.xlu1 %v1712_v57 }
 0x581   : > { %1716 = vadd.xlane.f32.xlu0 %v1715_v58 }
 0x5ac   : > { %2062 = vxpose.xlu1.c.b16.start.end [1/1] (short) (narrow) %v1960_v27, 16 }
 0x5ae   : > { %2078 = vxpose.xlu0.c.b16.start.end [1/1] (short) (narrow) %v1964_v63, 16 }
 0x5cc   : > { %v1974_v1 = vpop.trf.xlu1 }
 0x5ce   : > { %v1990_v2 = vpop.trf.xlu0 }
 0x5d0   : > { %v2006_v3 = vpop.trf.xlu1 }
 0x5d2   : > { %v2022_v61 = vpop.trf.xlu0 }
 0x5d4   : > { %v2038_v5 = vpop.trf.xlu1 }
 0x5d5   : > { %v2094_v12 = vcombine.low %v1974_v1, %v2038_v5 }
 0x5d6   : > { %v2054_v6 = vpop.trf.xlu0 }
 0x5d7   : > { %v2119_v18 = vcombine.low %v1990_v2, %v2054_v6  ;;  %v2101_v23 = vrot.slane %v2094_v12, %v3972_v29 }
 0x5d9   : > { %v2126_v37 = vrot.slane %v2119_v18, %v3972_v29 }
 0x608   : > { %v1708_v7 = vpop.xlane.xlu1 %1707 }
 0x609   : > { %3377 = vrcp.f32 %v1708_v7 }
 0x60a   : > { %v1711_v9 = vpop.xlane.xlu0 %1710 }
 0x60b   : > { %3379 = vrcp.f32 %v1711_v9 }
 0x60c   : > { %v1714_v10 = vpop.xlane.xlu1 %1713 }
 0x60d   : > { %3381 = vrcp.f32 %v1714_v10 }
 0x60e   : > { %v1717_v11 = vpop.xlane.xlu0 %1716 }
 0x60f   : > { %3383 = vrcp.f32 %v1717_v11 }
 0x612   : > { %v2070_v14 = vpop.trf.xlu1 }
 0x613   : > { %v3378_v16 = vpop.eup %3377  ;;  %v2102_v19 = vcombine.low %v2006_v3, %v2070_v14 }
 0x614   : > { %v2086_v20 = vpop.trf.xlu0  ;;  %v1722_v21 = vmul.f32 %v3378_v16, %v3370_v4 }
 0x615   : > { %v3380_v22 = vpop.eup %3379  ;;  %v2109_v24 = vrot.slane %v2102_v19, %v3972_v29  ;;  %v2127_v31 = vcombine.low %v2022_v61, %v2086_v20 }
 0x616   : > { %v1726_v33 = vpack.c.bf16 %v1722_v21, %v1722_v21  ;;  %v1723_v34 = vmul.f32 %v3380_v22, %v3372_v13 }
 0x617   : > { %v3382_v36 = vpop.eup %3381  ;;  %v2110_v38 = vcombine.low %v2101_v23, %v2109_v24  ;;  %v2134_v39 = vrot.slane %v2127_v31, %v3972_v29 }
 0x618   : > { %v2160_v26 = vsel %vm1496_vm3, %v1726_v33, 0  ;;  %v1727_v40 = vpack.c.bf16 %v1723_v34, %v1723_v34  ;;  %v1724_v41 = vmul.f32 %v3382_v36, %v3374_v28  ;;  %v3361_v33 = vld [vmem:[#allocation5] sm:$0xff]  }
 0x619   : > { %v3384_v42 = vpop.eup %3383  ;;  %v2117_v43 = vrot.slane %v2110_v38, %v3984_v35  ;;  %v2135_v44 = vcombine.low %v2126_v37, %v2134_v39  ;;  %3186 = vmatpush3.bf16.xpose.msra.mxu0 %v2160_v26 }
 0x61a   : > { %v2206_v45 = vsel %vm1496_vm3, %v1727_v40, 0  ;;  %3197 = vmatprep.subr.bf16.mxu0 %v3629_v0  ;;  %v1725_v46 = vmul.f32 %v3384_v42, %v3376_v15  ;;  %v1728_v48 = vpack.c.bf16 %v1724_v41, %v1724_v41  ;;  %v3362_v42 = vld [vmem:[#allocation5 + $0x8] sm:$0xff]  }
 0x61b   : > { %v2142_v47 = vrot.slane %v2135_v44, %v3984_v35  ;;  %3192 = vmatpush3.bf16.xpose.msra.mxu1 %v2206_v45  ;;  %v2147_v49 = vshrl.u32 %v2117_v43, 16  ;;  %v2118_v55 = vcombine.high %v2117_v43, %v3636_v30 }
 0x61c   : > { %3203 = vmatprep.subr.bf16.mxu1 %v3629_v0  ;;  %v1729_v52 = vpack.c.bf16 %v1725_v46, %v1725_v46  ;;  %v2252_v54 = vsel %vm1496_vm3, %v1728_v48, 0 }
 0x61d   : > { %v2146_v50 = vpack.i.b16 %v2142_v47, %v2117_v43  ;;  %v2148_v51 = vshrl.u32 %v2142_v47, 16  ;;  %v2143_v8 = vcombine.high %v2142_v47, %v3636_v30  ;;  %v2153_v13 = vshrl.u32 %v2118_v55, 16 }
 0x61e   : > { %v2298_v56 = vsel %vm1496_vm3, %v1729_v52, 0 }
 0x61f   : > { %v2149_v53 = vpack.i.b16 %v2148_v51, %v2147_v49  ;;  %v2154_v4 = vshrl.u32 %v2143_v8, 16  ;;  %v2152_v25 = vpack.i.b16 %v2143_v8, %v2118_v55 }
 0x620   : > { %3188 = vmatmul.mubr.msk.bf16.vlgmr.msra.gmra.mrb[8].mxu0 %vm1496_vm3, %v2146_v50 }
 0x621   : > { %3198 = vmatpush3.bf16.xpose.msra.mxu0 %v2252_v54  ;;  %3199 = vmatprep.mubr.msk.bf16.mxu0 %vm3630_vm0, %v3629_v0  ;;  %v2155_v28 = vpack.i.b16 %v2154_v4, %v2153_v13 }
 0x622   : > { %3194 = vmatmul.mubr.msk.bf16.vlgmr.msra.gmra.mrb[16].mxu1 %vm1496_vm3, %v2149_v53  ;;  %3209 = vmatprep.subr.bf16.mxu0 %v3629_v0 }
 0x623   : > { %3204 = vmatpush3.bf16.xpose.msra.mxu1 %v2298_v56  ;;  %3205 = vmatprep.mubr.msk.bf16.mxu1 %vm3630_vm0, %v3629_v0 }
 0x624   : > { %3217 = vmatprep.subr.bf16.mxu1 %v3629_v0 }
 0x628   : > { %3200 = vmatmul.mubr.msk.bf16.vlgmr.msra.gmra.mrb[12].mxu0 %vm1496_vm3, %v2152_v25 }
 0x629   : > { %3213 = vmatprep.mubr.msk.bf16.mxu0 %vm3630_vm0, %v3629_v0  ;;  %3210 = vmatpush3.bf16.msra.mxu0 %v3361_v33  ;;  %v3096_v33 = vld [vmem:[%s4288_s11] ss:$0 sm:$0xff] }
 0x62a   : > { %3206 = vmatmul.mubr.msk.bf16.vlgmr.msra.gmra.mrb[20].mxu1 %vm1496_vm3, %v2155_v28  ;;  %3211 = vmatprep.subr.bf16.mxu0 %v3629_v0 }
 0x62b   : > { %3221 = vmatprep.mubr.msk.bf16.mxu1 %vm3630_vm0, %v3629_v0 }
 0x62d   : > { %3212 = vmatpush3.bf16.msra.mxu0 %v3362_v42 }
 0x62e   : > { %3225 = vmatprep.subr.bf16.mxu0 %v3629_v0 }
 0x6f3   : > { %v2196_v30 = vpop.f32.mrb[8].mxu0 }
 0x6f4   : > { %2340 = vxpose.xlu1.b32.start.end [1/1] (short) (narrow) %v2196_v30, 8  ;;  %v3189_v17 = vpop.f32.mrb[9].mxu0 }
 0x6f5   : > { %v2199_v15 = vpop.f32.mrb[10].mxu0  ;;  %v2242_v57 = vpop.f32.mrb[16].mxu1 }
 0x6f6   : > { %v3190_v58 = vpop.f32.mrb[11].mxu0  ;;  %2372 = vxpose.xlu0.b32.start.end [1/1] (short) (narrow) %v2242_v57, 8  ;;  %v3195_v32 = vpop.f32.mrb[17].mxu1  ;;  %v3090_v15 = vld [vmem:[#allocation7] ss:$0 sm:$0xff] }
 0x6f7   : > { %v2245_v59 = vpop.f32.mrb[18].mxu1 }
 0x6f8   : > { %v3196_v60 = vpop.f32.mrb[19].mxu1 }
 0x6fb   : > { %v2288_v27 = vpop.f32.mrb[12].mxu0 }
 0x6fc   : > { %v3201_v62 = vpop.f32.mrb[13].mxu0  ;;  %2404 = vxpose.xlu0.b32.start.end [1/1] (short) (narrow) %v2288_v27, 8  ;;  %v3389_v27 = vld [vmem:[%s3933_s23] sm:$0xff] }
 0x6fd   : > { %v2291_v63 = vpop.f32.mrb[14].mxu0  ;;  %v2334_v1 = vpop.f32.mrb[20].mxu1 }
 0x6fe   : > { %v3202_v2 = vpop.f32.mrb[15].mxu0  ;;  %2436 = vxpose.xlu1.b32.start.end [1/1] (short) (narrow) %v2334_v1, 8  ;;  %v3207_v3 = vpop.f32.mrb[21].mxu1 }
 0x6ff   : > { %v2337_v61 = vpop.f32.mrb[22].mxu1 }
 0x700   : > { %v3208_v5 = vpop.f32.mrb[23].mxu1 }
 0x774   : > { %v2356_v7 = vpop.trf.xlu1 }
 0x776   : > { %v2388_v6 = vpop.trf.xlu0 }
 0x77c   : > { %v2420_v9 = vpop.trf.xlu0 }
 0x77d   : > { %v2468_v10 = vcombine.low %v2356_v7, %v2420_v9  ;;  %v2469_v11 = vcombine.high %v2356_v7, %v2420_v9  ;;  %v3364_v7 = vld [vmem:[%s4287_s10 + $0x8] sm:$0xff]   ;;  %v3365_v9 = vld [vmem:[%s4289_s12] sm:$0xff]  }
 0x77e   : > { %v2452_v12 = vpop.trf.xlu1 }
 0x77f   : > { %v2484_v14 = vcombine.low %v2388_v6, %v2452_v12  ;;  %v2485_v16 = vcombine.high %v2388_v6, %v2452_v12  ;;  %v2476_v18 = vrot.slane %v2468_v10, %v3972_v29  ;;  %v2483_v19 = vrot.slane %v2469_v11, %v3972_v29  ;;  %v3363_v6 = vld [vmem:[%s4287_s10] sm:$0xff]   ;;  %v3366_v10 = vld [vmem:[%s4289_s12 + $0x8] sm:$0xff]  }
 0x780   : > { %3218 = vmatpush3.bf16.msra.mxu1 %v3363_v6 }
 0x781   : > { %v2492_v20 = vrot.slane %v2484_v14, %v3972_v29  ;;  %v2499_v21 = vrot.slane %v2485_v16, %v3972_v29  ;;  %3219 = vmatprep.subr.bf16.mxu1 %v3629_v0 }
 0x783   : > { %v2500_v22 = vcombine.low %v2476_v18, %v2492_v20  ;;  %v2501_v23 = vcombine.high %v2476_v18, %v2492_v20  ;;  %v2516_v24 = vcombine.low %v2483_v19, %v2499_v21  ;;  %v2517_v31 = vcombine.high %v2483_v19, %v2499_v21  ;;  %v3094_v18 = vld [vmem:[#allocation8] ss:$0 sm:$0xff]  ;;  %v3095_v20 = vld [vmem:[#allocation10] ss:$0 sm:$0xff] }
 0x784   : > { %3220 = vmatpush3.bf16.msra.mxu1 %v3364_v7 }
 0x785   : > { %v2508_v34 = vrot.slane %v2500_v22, %v3984_v35  ;;  %v2515_v36 = vrot.slane %v2501_v23, %v3984_v35  ;;  %v2524_v37 = vrot.slane %v2516_v24, %v3984_v35  ;;  %v2531_v38 = vrot.slane %v2517_v31, %v3984_v35  ;;  %v3367_v24 = vld [vmem:[%s4289_s12 + $0x10] sm:$0xff]   ;;  %v3368_v31 = vld [vmem:[%s4289_s12 + $0x18] sm:$0xff]  }
 0x787   : > { %v2536_v39 = vcombine.low %v2508_v34, %v2515_v36  ;;  %v3088_v26 = vcombine.high %v2508_v34, %v2515_v36  ;;  %v2552_v40 = vcombine.low %v2524_v37, %v2531_v38  ;;  %v3089_v41 = vcombine.high %v2524_v37, %v2531_v38 }
 0x789   : > { %v2543_v43 = vrot.slane %v2536_v39, %v3972_v29  ;;  %v2551_v44 = vrot.slane %v3088_v26, %v3972_v29  ;;  %v2559_v45 = vrot.slane %v2552_v40, %v3972_v29  ;;  %v2567_v46 = vrot.slane %v3089_v41, %v3972_v29 }
 0x78b   : > { %v2569_v47 = vcombine.high %v2543_v43, %v2551_v44  ;;  %v2585_v48 = vcombine.high %v2559_v45, %v2567_v46  ;;  %v2568_v49 = vcombine.low %v2543_v43, %v2551_v44  ;;  %v2584_v50 = vcombine.low %v2559_v45, %v2567_v46 }
 0x78d   : > { %v2583_v51 = vrot.slane %v2569_v47, %v3984_v35  ;;  %v2599_v52 = vrot.slane %v2585_v48, %v3984_v35  ;;  %v2576_v53 = vrot.slane %v2568_v49, %v3984_v35  ;;  %v2592_v8 = vrot.slane %v2584_v50, %v3984_v35 }
 0x78f   : > { %v2602_v54 = vcombine.low %v2583_v51, %v2599_v52  ;;  %v2601_v55 = vcombine.high %v2576_v53, %v2592_v8  ;;  %v2600_v56 = vcombine.low %v2576_v53, %v2592_v8  ;;  %v2603_v29 = vcombine.high %v2583_v51, %v2599_v52 }
 0x791   : > { %2609 = vrot.lane.b32.xlu1 %v2602_v54, %s3638_s0  ;;  %2605 = vrot.lane.b32.xlu0 %v2601_v55, %s3639_s30  ;;  %s4339_s0 = sld [smem:[#allocation28_spill]] }
 0x795   : > { %2613 = vrot.lane.b32.xlu1 %v2603_v29, %s3640_s19  ;;  %s4335_s19 = sld [smem:[#allocation17_spill]] }
 0x797   : > { %s4229_s30 = scalar_lea.hbm %s4339_s0, %s3109_s22 }
 0x79b   : > { %s612_s17 = sand.u32 1, %s4335_s19  }
 0x79c   : > { %s3065_s14 = sshll.u32 %s612_s17, 3  ;;  %s2903_s19 = scalar_lea.sflag [#allocation4], %s612_s17 }
 0x79d   : > { %s614_s29 = scalar_lea.vmem [#allocation11], %s3065_s14  ;;  %s3534_s14 = sshll.u32 %s3641_s24, 4  ;;  %s3535_s14 = int_to_ptr.vmem [resolvable:$false] %s3534_s14 }
 0x79e   : > { %s2917_s20 = sshll.u32 %s614_s29, 4  ;;  %s3536_s23 = scalar_lea.vmem %s3535_s14, 256  ;;  %s4231_s20 = int_to_ptr.vmem [resolvable:$true] %s2917_s20 }
 0x79f   : > { %s3530_s25 = scalar_lea.vmem %s4231_s20, 128  ;;  %p3537_p2 = scmp.lt.s32.totalorder %s4231_s20, %s3535_s14 }
 0x7a0   : > { %p3531_p1 = scmp.ne.s32.totalorder %s4231_s20, %s3530_s25  ;;  %p3538_p3 = scmp.lt.s32.totalorder %s3536_s23, %s3530_s25 }
 0x7a2   : > { %p3532_p11 = pnand %p3531_p1, %p4340_p10  ;;  %p3539_p5 = por %p3538_p3, %p3537_p2 }
 0x7a4   : > { %p3533_p0 = pneg %p3532_p11 }
 0x7a6   : > { %p3540_p6 = pnand %p3539_p5, %p3533_p0 }
 0x803   : > { %v2610_v4 = vpop.permute.xlu1 %2609  ;;  %v2606_v13 = vpop.permute.xlu0 %2605 }
 0x804   : > { %v2616_v25 = vsel %vm1496_vm3, %v2600_v56, %v2606_v13  ;;  %v3106_v56 = vld [vmem:[%s4337_s18] ss:$0 sm:$0xff] }
 0x805   : > { %v2618_v30 = vsel %vm2617_vm4, %v2616_v25, %v2610_v4  ;;  %v3107_v4 = vld [vmem:[%s4338_s26] ss:$0 sm:$0xff] }
 0x807   : > { %v2614_v28 = vpop.permute.xlu1 %2613 }
 0x808   : > { %v2620_v35 = vsel %vm2619_vm5, %v2618_v30, %v2614_v28 }
 0x809   : > { %v2621_v17 = vpack.c.bf16 %v2620_v35, %v2620_v35 }
 0x80b   : > { %3214 = vmatmul.mubr.msk.bf16.vlgmr.msra.gmra.mrb[16].mxu0 %vm654_vm1, %v2621_v17 }
 0x80c   : > { %3233 = vmatprep.mubr.msk.bf16.mxu0 %vm3630_vm0, %v3629_v0  ;;  %3226 = vmatpush3.bf16.msra.mxu0 %v3365_v9 }
 0x80d   : > { %3227 = vmatprep.subr.bf16.mxu0 %v3629_v0 }
 0x810   : > { %3228 = vmatpush3.bf16.msra.mxu0 %v3366_v10 }
 0x811   : > { %3229 = vmatprep.subr.bf16.mxu0 %v3629_v0 }
 0x814   : > { %3230 = vmatpush3.bf16.msra.mxu0 %v3367_v24 }
 0x815   : > { %3231 = vmatprep.subr.bf16.mxu0 %v3629_v0  ;;  %v3100_v0 = vld [vmem:[%s4290_s13] ss:$0 sm:$0xff] }
 0x818   : > { %3232 = vmatpush3.bf16.msra.mxu0 %v3368_v31 }
 0x8de   : > { %v2682_v57 = vpop.f32.mrb[16].mxu0 }
 0x8df   : > { %v2683_v58 = vadd.f32 %v3090_v15, %v2682_v57  ;;  %v3215_v32 = vpop.f32.mrb[17].mxu0 }
 0x8e0   : > { %v2685_v59 = vpop.f32.mrb[18].mxu0 }
 0x8e1   : > { %v3216_v60 = vpop.f32.mrb[19].mxu0  ;;  %v2688_v62 = vadd.f32 %v3389_v27, %v2683_v58 }
 0x8e3   : > { %v2689_v63 = vsel %vm654_vm1, %v2688_v62, 0.0 }
 0x8e4   : > { %2690 = vadd.xlane.f32.xlu1 %v2689_v63 }
 0x971   : > { %v2691_v1 = vpop.xlane.xlu1 %2690 }
 0x972   : > { %v2693_v2 = vmul.f32 0.03125, %v2691_v1 }
 0x974   : > { %v2694_v3 = vsub.f32 %v2688_v62, %v2693_v2 }
 0x976   : > { %v2695_v61 = vmul.f32 %v2694_v3, %v2694_v3 }
 0x978   : > { %v2696_v5 = vsel %vm654_vm1, %v2695_v61, 0.0 }
 0x979   : > { %2697 = vadd.xlane.f32.xlu0 %v2696_v5 }
 0xa06   : > { %v2698_v11 = vpop.xlane.xlu0 %2697 }
 0xa07   : > { %v2699_v12 = vmul.f32 0.03125, %v2698_v11 }
 0xa09   : > { %v2700_v14 = vadd.f32 1e-05, %v2699_v12 }
 0xa0b   : > { %3385 = vrsqrt.f32 %v2700_v14 }
 0xa15   : > { %v3386_v16 = vpop.eup %3385 }
 0xa16   : > { %v2702_v19 = vmul.f32 %v3386_v16, %v2694_v3 }
 0xa18   : > { %v2710_v21 = vmul.f32 %v3094_v18, %v2702_v19 }
 0xa1a   : > { %v2718_v22 = vadd.f32 %v3095_v20, %v2710_v21 }
 0xa1c   : > { %v2719_v23 = vpack.c.bf16 %v2718_v22, %v2718_v22 }
 0xa1e   : > { %3222 = vmatmul.mubr.msk.bf16.vlgmr.msra.gmra.mrb[24].mxu1 %vm654_vm1, %v2719_v23 }
 0xaf1   : > { %v2780_v34 = vpop.f32.mrb[24].mxu1 }
 0xaf2   : > { %v2781_v36 = vadd.f32 %v3096_v33, %v2780_v34  ;;  %v3223_v37 = vpop.f32.mrb[25].mxu1 }
 0xaf3   : > { %v2783_v38 = vpop.f32.mrb[26].mxu1 }
 0xaf4   : > { %v2786_v39 = vmax.f32 %v2781_v36, 0.0  ;;  %v3224_v26 = vpop.f32.mrb[27].mxu1 }
 0xaf6   : > { %v2787_v40 = vpack.c.bf16 %v2786_v39, %v2786_v39 }
 0xaf8   : > { %3234 = vmatmul.mubr.msk.bf16.vlgmr.msra.gmra.mrb[20].mxu0 %vm2827_vm6, %v2787_v40 }
 0xbcb   : > { %v2865_v41 = vpop.f32.mrb[20].mxu0 }
 0xbcc   : > { %v2866_v42 = vadd.f32 %v3100_v0, %v2865_v41  ;;  %v3235_v43 = vpop.f32.mrb[21].mxu0 }
 0xbcd   : > { %v2868_v44 = vpop.f32.mrb[22].mxu0 }
 0xbce   : > { %v3236_v45 = vpop.f32.mrb[23].mxu0  ;;  %v2871_v46 = vadd.f32 %v2866_v42, %v2718_v22 }
 0xbd0   : > { %v2872_v47 = vsel %vm654_vm1, %v2871_v46, 0.0 }
 0xbd1   : > { %2873 = vadd.xlane.f32.xlu0 %v2872_v47 }
 0xc5e   : > { %v2874_v48 = vpop.xlane.xlu0 %2873 }
 0xc5f   : > { %v2875_v49 = vmul.f32 0.03125, %v2874_v48 }
 0xc61   : > { %v2876_v50 = vsub.f32 %v2871_v46, %v2875_v49 }
 0xc63   : > { %v2877_v51 = vmul.f32 %v2876_v50, %v2876_v50 }
 0xc65   : > { %v2878_v52 = vsel %vm654_vm1, %v2877_v51, 0.0 }
 0xc66   : > { %2879 = vadd.xlane.f32.xlu1 %v2878_v52 }
 0xcf3   : > { %v2880_v53 = vpop.xlane.xlu1 %2879 }
 0xcf4   : > { %v2881_v8 = vmul.f32 0.03125, %v2880_v53 }
 0xcf6   : > { %v2882_v54 = vadd.f32 1e-05, %v2881_v8 }
 0xcf8   : > { %3387 = vrsqrt.f32 %v2882_v54 }
 0xd02   : > { %v3388_v55 = vpop.eup %3387 }
 0xd03   : > { %v2884_v29 = vmul.f32 %v3388_v55, %v2876_v50 }
 0xd05   : > { %v2892_v13 = vmul.f32 %v3106_v56, %v2884_v29 }
 0xd07   : > { %v2900_v25 = vadd.f32 %v3107_v4, %v2892_v13 }
 0xd09   : > { %2901 = vst.msk [vmem:[%s614_s29] sm:$0xff] %vm654_vm1, %v2900_v25 }
 0xd0a   : > { %3543 = shalt.err (!%p3540_p6)
}
 0xd0b   : > { %s3544_s17 = scalar_lea.hbm %s4229_s30, 128  ;;  %s3548_s16 = scalar_lea.hbm %s4339_s0, 256 }
 0xd0c   : > { %p3545_p7 = scmp.ne.s32.totalorder %s4229_s30, %s3544_s17  ;;  %p3549_p4 = scmp.lt.u32.totalorder %s4229_s30, %s4339_s0 }
 0xd0d   : > { %p3550_p8 = scmp.lt.u32.totalorder %s3548_s16, %s3544_s17  ;;  %p3552_p1 = scmp.lt.u32.totalorder %s3544_s17, %s4229_s30 }
 0xd0e   : > { %p3546_p9 = pnand %p3545_p7, %p4340_p10 }
 0xd0f   : > { %p3551_p13 = por %p3550_p8, %p3549_p4 }
 0xd10   : > { %p3547_p12 = pneg %p3546_p9 }
 0xd11   : > { %p3553_p11 = por %p3552_p1, %p3551_p13 }
 0xd13   : > { %p3554_p0 = pnand %p3553_p11, %p3547_p12 }
 0xd15   : > { %3557 = shalt.err (!%p3554_p0)
}
 0xd16   : > { %3257 = dma.vmem_to_hbm [thread:$0]  (%p4340_p10), %s4231_s20, 128, %s4229_s30, %s2903_s19  }
 0xd17 PF: > { %s4341_s29 = sld [smem:[#allocation20_spill]]  ;;  %s4342_s28 = sld [smem:[#allocation16_spill]] }
 0xd18   : > { %s4343_s21 = sld [smem:[#allocation23_spill]] }
 0xd1d   : > { %p3289_p2 = scmp.ge.s32.totalorder %s4341_s29, 2  ;;  %s2929_s25 = sand.u32 1, %s4342_s28  }
 0xd1e   : > { %p4344_p3 = scmp.ne.s32.totalorder %s4343_s21, 0  ;;  %s2930_s24 = scalar_lea.sflag [#allocation4], %s2929_s25 }
 0xd20   : > { %p3276_p5 = pnand %p3289_p2, %p4344_p3 }
 0xd22   : > { %3595 = dma.done.wait (!%p3276_p5), %s2930_s24, 128  }
 0xd23   : > { %3597 = vsyncadd (!%p3276_p5), %s2930_s24, 4294967168  ;;  %s32_s26 = sadd.s32 1, %s4341_s29   ;;  %s4345_s21 = sld [smem:[#allocation17_spill]] }
 0xd24   : > { %p29_p6 = scmp.ge.s32.totalorder %s32_s26, 4   ;;  %s4346_s22 = sld [smem:[#allocation18_spill]] }
 0xd25   : > { %s4347_s23 = sld [smem:[#allocation24_spill]]  ;;  %s4348_s24 = sld [smem:[#allocation19_spill]] }
 0xd26   : > { %s4349_s25 = sld [smem:[#allocation21_spill]]  ;;  %31 = sbr.rel (!%p29_p6) target bundleno = 12 (0xc), region = 143 }
 0xd2d   :  { %2935 = vsyncpa [#allocation3], 1 }
 0xd2e   :  { %2937 = vsyncpa [#allocation3 + $0x1], 1 }
 0xd2f   :  { %2938 = vsyncpa [#allocation6], 1 }
 0xd30   :  { %2939 = vsyncpa [#allocation9], 1 }
 0xd31   :  { %2940 = vsyncpa [#allocation4], 1 }
 0xd32   :  { %2942 = vsyncpa [#allocation4 + $0x1], 1 }

</bundles_post_ra>
